<compile_context>
chip_gen: v5e
topology: v5e:2x2
jax: 0.10.0
libtpu: 0.0.40
codegen_flags: <defaults>
</compile_context>

<pallas_src>
import functools

import jax
import jax.numpy as jnp
from jax.experimental import pallas as pl
from jax.experimental.pallas import tpu as pltpu


def _round_up(n, m):
    return ((n + m - 1) // m) * m


def vae_kernel(
    xe_ref,                                              # packed [x | eps | pad], bf16
    w1_ref, b1_ref, w2_ref, b2_ref,                      # encoder
    wmulv_ref, bmulv_ref,                                # fused [mu | logvar] head
    wd1_ref, bd1_ref, wd2_ref, bd2_ref, wd3_ref, bd3_ref,  # decoder
    out_ref,                                             # packed [recon | mu | logvar | pad]
    *, n_in, latent_dim, out_width,
):
    def mm(a, w_ref):
        # bf16 operands on the MXU, f32 accumulation.
        return jnp.dot(a.astype(jnp.bfloat16), w_ref[...],
                       preferred_element_type=jnp.float32)

    xe = xe_ref[...]                                     # (tb, in_width), bf16
    x = xe[:, :n_in]                                     # bf16: fed straight to the MXU
    eps = xe[:, n_in:n_in + latent_dim].astype(jnp.float32)

    # ---- encoder: Linear -> ReLU -> Linear -> ReLU ----
    h = jnp.maximum(mm(x, w1_ref) + b1_ref[...], 0.0)
    h = jnp.maximum(mm(h, w2_ref) + b2_ref[...], 0.0)

    # ---- fused latent heads: one matmul yields [mu | logvar] ----
    mulv = mm(h, wmulv_ref) + bmulv_ref[...]             # (tb, 2*latent), f32
    mu = mulv[:, :latent_dim]
    logvar = mulv[:, latent_dim:]

    # ---- reparametrize (f32 elementwise): z = mu + eps * exp(0.5 * logvar) ----
    z = mu + eps * jnp.exp(0.5 * logvar)

    # ---- decoder: Linear -> ReLU -> Linear -> ReLU -> Linear ----
    d = jnp.maximum(mm(z, wd1_ref) + bd1_ref[...], 0.0)
    d = jnp.maximum(mm(d, wd2_ref) + bd2_ref[...], 0.0)
    recon = mm(d, wd3_ref) + bd3_ref[...]

    # ---- single lane-dense store: [recon | mu | logvar | zero pad] ----
    parts = [recon, mulv]
    pad = out_width - (n_in + 2 * latent_dim)
    if pad > 0:
        parts.append(jnp.zeros((recon.shape[0], pad), jnp.float32))
    out_ref[...] = jnp.concatenate(parts, axis=-1).astype(out_ref.dtype)


def vae_forward(x, eps, params, *, tb=256, out_dtype=jnp.bfloat16):
    """Run the fused VAE forward pass, tiled over the batch dimension.

    Returns (recon, mu, logvar) in `out_dtype` (bf16 by default: halves the kernel's
    HBM writeback; pass out_dtype=jnp.float32 if the downstream loss needs full f32).
    """
    B, n_in = x.shape
    latent_dim = eps.shape[1]
    assert B % tb == 0 and tb % 8 == 0, (B, tb)

    in_width = _round_up(n_in + latent_dim, 128)
    out_width = _round_up(n_in + 2 * latent_dim, 128)

    bf16 = jnp.bfloat16
    # ---- pack x and eps into ONE lane-dense bf16 input slab [x | eps | pad] ----
    slab = jnp.concatenate([x, eps], axis=1)
    pad_in = in_width - (n_in + latent_dim)
    if pad_in > 0:
        slab = jnp.concatenate([slab, jnp.zeros((B, pad_in), slab.dtype)], axis=1)
    slab = slab.astype(bf16)

    # One-time parameter prep: fuse the mu/logvar heads, cast matmul weights to bf16
    # (halves weight DMA/VMEM), keep biases in f32 for the f32 epilogue adds.
    wmulv = jnp.concatenate([params["wmu"], params["wlv"]], axis=1).astype(bf16)
    bmulv = jnp.concatenate([params["bmu"], params["blv"]], axis=1)
    flat = [
        params["w1"].astype(bf16), params["b1"],
        params["w2"].astype(bf16), params["b2"],
        wmulv, bmulv,
        params["wd1"].astype(bf16), params["bd1"],
        params["wd2"].astype(bf16), params["bd2"],
        params["wd3"].astype(bf16), params["bd3"],
    ]

    param_bytes = sum(int(a.size) * a.dtype.itemsize for a in flat)
    # TODO(synk): at production widths (e.g. n_hid >= 4096) the two n_hid x n_hid bf16
    # layers alone exceed v7x's 64 MiB per-core VMEM; that regime needs a K-tiled
    # variant (hidden-dim grid axis marked "arbitrary" + f32 accumulator scratch +
    # pl.when init/finalize for w2/wd2) instead of this all-weights-resident layout.
    if 2 * param_bytes > (48 << 20):
        raise NotImplementedError(
            "VAE weights (~%d MiB double-buffered) do not fit the all-weights-resident "
            "Pallas layout on v7x; a K-tiled variant is required." % (2 * param_bytes >> 20))

    # Explicit VMEM budget: actual need (weights worst-case double-buffered, streamed
    # slabs with their buffer counts, f32 intermediates) + generous headroom, capped
    # well below v7x's 64 MiB physical VMEM. Also overrides v5e's 16 MiB scoped default.
    stream_bytes = 3 * tb * in_width * 2 + 2 * tb * out_width * jnp.dtype(out_dtype).itemsize
    interm_bytes = 8 * tb * max(n_in, 2 * latent_dim,
                                params["w1"].shape[1]) * 4
    need = 2 * param_bytes + stream_bytes + interm_bytes
    vmem_limit = int(min(56 << 20, max(16 << 20, 4 * need)))

    kernel = functools.partial(
        vae_kernel, n_in=n_in, latent_dim=latent_dim, out_width=out_width)

    def run(tuned_buffering):
        def stream_spec(cols, nbuf):
            if tuned_buffering and nbuf is not None:
                # Deeper pipelining on the streamed slab: compute per step is tiny, so
                # keeping an extra DMA in flight hides latency; VMEM cost is small.
                return pl.BlockSpec((tb, cols), lambda i: (i, 0),
                                    pipeline_mode=pl.Buffered(nbuf))
            return pl.BlockSpec((tb, cols), lambda i: (i, 0))

        def const_spec(arr):
            if tuned_buffering:
                # Grid-invariant block (same index every step): one VMEM buffer is
                # enough; double-buffering it is pure VMEM waste.
                return pl.BlockSpec(arr.shape, lambda i: (0, 0),
                                    pipeline_mode=pl.Buffered(1))
            return pl.BlockSpec(arr.shape, lambda i: (0, 0))

        return pl.pallas_call(
            kernel,
            out_shape=jax.ShapeDtypeStruct((B, out_width), out_dtype),
            grid_spec=pltpu.PrefetchScalarGridSpec(
                num_scalar_prefetch=0,
                grid=(B // tb,),
                in_specs=[stream_spec(in_width, 3)] + [const_spec(a) for a in flat],
                out_specs=stream_spec(out_width, None),
            ),
            compiler_params=pltpu.CompilerParams(
                dimension_semantics=("parallel",),
                vmem_limit_bytes=vmem_limit,
            ),
        )(slab, *flat)

    # Narrow fallback: only buffering-related lowering rejections trigger the retry
    # with default (double) buffering; semantics are identical either way.
    fallback_errors = (pltpu.LoweringException, NotImplementedError, ValueError, TypeError)
    jre = getattr(jax.errors, "JaxRuntimeError", None)
    if jre is not None:
        fallback_errors = fallback_errors + (jre,)
    try:
        out = run(tuned_buffering=True)
    except fallback_errors:
        out = run(tuned_buffering=False)

    recon = out[:, :n_in]
    mu = out[:, n_in:n_in + latent_dim]
    logvar = out[:, n_in + latent_dim:n_in + 2 * latent_dim]
    return recon, mu, logvar


def init_linear(key, fan_in, fan_out):
    """PyTorch nn.Linear default init (uniform +-1/sqrt(fan_in)); weight stored
    pre-transposed as (in, out)."""
    kw, kb = jax.random.split(key)
    bound = 1.0 / jnp.sqrt(fan_in)
    w = jax.random.uniform(kw, (fan_in, fan_out), jnp.float32, -bound, bound)
    b = jax.random.uniform(kb, (1, fan_out), jnp.float32, -bound, bound)
    return w, b


def make_params(key, n_in, latent_dim, n_hid):
    keys = jax.random.split(key, 7)
    w1, b1 = init_linear(keys[0], n_in, n_hid)
    w2, b2 = init_linear(keys[1], n_hid, n_hid)
    wmu, bmu = init_linear(keys[2], n_hid, latent_dim)
    wlv, blv = init_linear(keys[3], n_hid, latent_dim)
    wd1, bd1 = init_linear(keys[4], latent_dim, n_hid)
    wd2, bd2 = init_linear(keys[5], n_hid, n_hid)
    wd3, bd3 = init_linear(keys[6], n_hid, n_in)
    return dict(w1=w1, b1=b1, w2=w2, b2=b2, wmu=wmu, bmu=bmu, wlv=wlv, blv=blv,
                wd1=wd1, bd1=bd1, wd2=wd2, bd2=bd2, wd3=wd3, bd3=bd3)


def vae_reference(x, eps, p):
    """Plain-JAX reference mirroring the kernel's precision (bf16 matmul operands and
    bf16-quantized x/eps, f32 accumulation/elementwise); semantically identical to the
    PyTorch VAE forward with eps supplied externally."""
    def mm(a, w):
        return jnp.dot(a.astype(jnp.bfloat16), w.astype(jnp.bfloat16),
                       preferred_element_type=jnp.float32)
    eps = eps.astype(jnp.bfloat16).astype(jnp.float32)   # matches the packed bf16 slab
    h = jnp.maximum(mm(x, p["w1"]) + p["b1"], 0.0)
    h = jnp.maximum(mm(h, p["w2"]) + p["b2"], 0.0)
    mu = mm(h, p["wmu"]) + p["bmu"]
    logvar = mm(h, p["wlv"]) + p["blv"]
    z = mu + eps * jnp.exp(0.5 * logvar)
    d = jnp.maximum(mm(z, p["wd1"]) + p["bd1"], 0.0)
    d = jnp.maximum(mm(d, p["wd2"]) + p["bd2"], 0.0)
    recon = mm(d, p["wd3"]) + p["bd3"]
    return recon, mu, logvar


if __name__ == "__main__":
    # Small feature dims consistent with the toy module, but a batch large enough for
    # lane/sublane-dense tiles and a 4-step parallel grid (>= 2 steps per core on v7x).
    n_in, latent_dim, n_hid = 64, 32, 128
    batch, tb = 1024, 256

    key = jax.random.PRNGKey(0)
    k_params, k_x, k_eps = jax.random.split(key, 3)

    params = make_params(k_params, n_in, latent_dim, n_hid)
    x = jax.random.normal(k_x, (batch, n_in), jnp.float32)
    # The PyTorch module samples eps internally with randn_like; here eps is sampled
    # host-side for determinism and fed in; the kernel applies mu + eps*exp(0.5*logvar).
    eps = jax.random.normal(k_eps, (batch, latent_dim), jnp.float32)

    recon, mu, logvar = vae_forward(x, eps, params, tb=tb)
    jax.block_until_ready((recon, mu, logvar))

    r_ref, mu_ref, lv_ref = vae_reference(x, eps, params)
    # bf16 matmul operands + bf16 output slab -> loosened tolerance vs. a pure-f32 check.
    assert jnp.allclose(recon.astype(jnp.float32), r_ref, atol=2e-2, rtol=2e-2)
    assert jnp.allclose(mu.astype(jnp.float32), mu_ref, atol=2e-2, rtol=2e-2)
    assert jnp.allclose(logvar.astype(jnp.float32), lv_ref, atol=2e-2, rtol=2e-2)

    print("KERNEL_OK")
</pallas_src>

<mosaic_0001>
module attributes {stable_mosaic.version = 11 : i64} {
  func.func @vae_kernel(%arg0: i32, %arg1: memref<256x128xbf16, #tpu.memory_space<vmem>>, %arg2: memref<64x128xbf16, #tpu.memory_space<vmem>>, %arg3: memref<1x128xf32, #tpu.memory_space<vmem>>, %arg4: memref<128x128xbf16, #tpu.memory_space<vmem>>, %arg5: memref<1x128xf32, #tpu.memory_space<vmem>>, %arg6: memref<128x64xbf16, #tpu.memory_space<vmem>>, %arg7: memref<1x64xf32, #tpu.memory_space<vmem>>, %arg8: memref<32x128xbf16, #tpu.memory_space<vmem>>, %arg9: memref<1x128xf32, #tpu.memory_space<vmem>>, %arg10: memref<128x128xbf16, #tpu.memory_space<vmem>>, %arg11: memref<1x128xf32, #tpu.memory_space<vmem>>, %arg12: memref<128x64xbf16, #tpu.memory_space<vmem>>, %arg13: memref<1x64xf32, #tpu.memory_space<vmem>>, %arg14: memref<256x128xbf16, #tpu.memory_space<vmem>>) attributes {dimension_semantics = [#tpu.dimension_semantics<parallel>], iteration_bounds = array<i64: 4>, scalar_prefetch = 0 : i64, scratch_operands = 0 : i64, tpu.core_type = #tpu.core_type<tc>, window_params = [{transform_indices = @transform_0, window_bounds = array<i64: 256, 128>}, {pipeline_mode = #tpu.pipeline_mode<synchronous>, transform_indices = @transform_1, window_bounds = array<i64: 64, 128>}, {pipeline_mode = #tpu.pipeline_mode<synchronous>, transform_indices = @transform_2, window_bounds = array<i64: 1, 128>}, {pipeline_mode = #tpu.pipeline_mode<synchronous>, transform_indices = @transform_3, window_bounds = array<i64: 128, 128>}, {pipeline_mode = #tpu.pipeline_mode<synchronous>, transform_indices = @transform_4, window_bounds = array<i64: 1, 128>}, {pipeline_mode = #tpu.pipeline_mode<synchronous>, transform_indices = @transform_5, window_bounds = array<i64: 128, 64>}, {pipeline_mode = #tpu.pipeline_mode<synchronous>, transform_indices = @transform_6, window_bounds = array<i64: 1, 64>}, {pipeline_mode = #tpu.pipeline_mode<synchronous>, transform_indices = @transform_7, window_bounds = array<i64: 32, 128>}, {pipeline_mode = #tpu.pipeline_mode<synchronous>, transform_indices = @transform_8, window_bounds = array<i64: 1, 128>}, {pipeline_mode = #tpu.pipeline_mode<synchronous>, transform_indices = @transform_9, window_bounds = array<i64: 128, 128>}, {pipeline_mode = #tpu.pipeline_mode<synchronous>, transform_indices = @transform_10, window_bounds = array<i64: 1, 128>}, {pipeline_mode = #tpu.pipeline_mode<synchronous>, transform_indices = @transform_11, window_bounds = array<i64: 128, 64>}, {pipeline_mode = #tpu.pipeline_mode<synchronous>, transform_indices = @transform_12, window_bounds = array<i64: 1, 64>}, {transform_indices = @transform_13, window_bounds = array<i64: 256, 128>}]} {
    %c0 = arith.constant 0 : index
    %c0_0 = arith.constant 0 : index
    %0 = vector.load %arg1[%c0, %c0_0] : memref<256x128xbf16, #tpu.memory_space<vmem>>, vector<256x128xbf16>
    %1 = vector.extract_strided_slice %0 {offsets = [0, 0], sizes = [256, 64], strides = [1, 1]} : vector<256x128xbf16> to vector<256x64xbf16>
    %2 = vector.extract_strided_slice %0 {offsets = [0, 64], sizes = [256, 32], strides = [1, 1]} : vector<256x128xbf16> to vector<256x32xbf16>
    %3 = arith.extf %2 : vector<256x32xbf16> to vector<256x32xf32>
    %c0_1 = arith.constant 0 : index
    %c0_2 = arith.constant 0 : index
    %4 = vector.load %arg2[%c0_1, %c0_2] : memref<64x128xbf16, #tpu.memory_space<vmem>>, vector<64x128xbf16>
    %cst = arith.constant dense<0.000000e+00> : vector<256x128xf32>
    %5 = tpu.matmul %1, %4, %cst {dimension_numbers = #tpu.dot_dimension_numbers<[1], [0], [0], [1], [0, 0, 1, 1], [], []>} : vector<256x64xbf16>, vector<64x128xbf16>, vector<256x128xf32> -> vector<256x128xf32>
    %c0_3 = arith.constant 0 : index
    %c0_4 = arith.constant 0 : index
    %6 = vector.load %arg3[%c0_3, %c0_4] : memref<1x128xf32, #tpu.memory_space<vmem>>, vector<1x128xf32>
    %7 = vector.broadcast %6 : vector<1x128xf32> to vector<256x128xf32>
    %8 = arith.addf %5, %7 : vector<256x128xf32>
    %cst_5 = arith.constant 0.000000e+00 : f32
    %9 = vector.broadcast %cst_5 : f32 to vector<256x128xf32>
    %10 = arith.maximumf %8, %9 : vector<256x128xf32>
    %11 = arith.truncf %10 : vector<256x128xf32> to vector<256x128xbf16>
    %c0_6 = arith.constant 0 : index
    %c0_7 = arith.constant 0 : index
    %12 = vector.load %arg4[%c0_6, %c0_7] : memref<128x128xbf16, #tpu.memory_space<vmem>>, vector<128x128xbf16>
    %cst_8 = arith.constant dense<0.000000e+00> : vector<256x128xf32>
    %13 = tpu.matmul %11, %12, %cst_8 {dimension_numbers = #tpu.dot_dimension_numbers<[1], [0], [0], [1], [0, 0, 1, 1], [], []>} : vector<256x128xbf16>, vector<128x128xbf16>, vector<256x128xf32> -> vector<256x128xf32>
    %c0_9 = arith.constant 0 : index
    %c0_10 = arith.constant 0 : index
    %14 = vector.load %arg5[%c0_9, %c0_10] : memref<1x128xf32, #tpu.memory_space<vmem>>, vector<1x128xf32>
    %15 = vector.broadcast %14 : vector<1x128xf32> to vector<256x128xf32>
    %16 = arith.addf %13, %15 : vector<256x128xf32>
    %cst_11 = arith.constant 0.000000e+00 : f32
    %17 = vector.broadcast %cst_11 : f32 to vector<256x128xf32>
    %18 = arith.maximumf %16, %17 : vector<256x128xf32>
    %19 = arith.truncf %18 : vector<256x128xf32> to vector<256x128xbf16>
    %c0_12 = arith.constant 0 : index
    %c0_13 = arith.constant 0 : index
    %20 = vector.load %arg6[%c0_12, %c0_13] : memref<128x64xbf16, #tpu.memory_space<vmem>>, vector<128x64xbf16>
    %cst_14 = arith.constant dense<0.000000e+00> : vector<256x64xf32>
    %21 = tpu.matmul %19, %20, %cst_14 {dimension_numbers = #tpu.dot_dimension_numbers<[1], [0], [0], [1], [0, 0, 1, 1], [], []>} : vector<256x128xbf16>, vector<128x64xbf16>, vector<256x64xf32> -> vector<256x64xf32>
    %c0_15 = arith.constant 0 : index
    %c0_16 = arith.constant 0 : index
    %22 = vector.load %arg7[%c0_15, %c0_16] : memref<1x64xf32, #tpu.memory_space<vmem>>, vector<1x64xf32>
    %23 = vector.broadcast %22 : vector<1x64xf32> to vector<256x64xf32>
    %24 = arith.addf %21, %23 : vector<256x64xf32>
    %25 = vector.extract_strided_slice %24 {offsets = [0, 0], sizes = [256, 32], strides = [1, 1]} : vector<256x64xf32> to vector<256x32xf32>
    %26 = vector.extract_strided_slice %24 {offsets = [0, 32], sizes = [256, 32], strides = [1, 1]} : vector<256x64xf32> to vector<256x32xf32>
    %cst_17 = arith.constant 5.000000e-01 : f32
    %27 = vector.broadcast %cst_17 : f32 to vector<256x32xf32>
    %28 = arith.mulf %27, %26 : vector<256x32xf32>
    %29 = math.exp %28 : vector<256x32xf32>
    %30 = arith.mulf %3, %29 : vector<256x32xf32>
    %31 = arith.addf %25, %30 : vector<256x32xf32>
    %32 = arith.truncf %31 : vector<256x32xf32> to vector<256x32xbf16>
    %c0_18 = arith.constant 0 : index
    %c0_19 = arith.constant 0 : index
    %33 = vector.load %arg8[%c0_18, %c0_19] : memref<32x128xbf16, #tpu.memory_space<vmem>>, vector<32x128xbf16>
    %cst_20 = arith.constant dense<0.000000e+00> : vector<256x128xf32>
    %34 = tpu.matmul %32, %33, %cst_20 {dimension_numbers = #tpu.dot_dimension_numbers<[1], [0], [0], [1], [0, 0, 1, 1], [], []>} : vector<256x32xbf16>, vector<32x128xbf16>, vector<256x128xf32> -> vector<256x128xf32>
    %c0_21 = arith.constant 0 : index
    %c0_22 = arith.constant 0 : index
    %35 = vector.load %arg9[%c0_21, %c0_22] : memref<1x128xf32, #tpu.memory_space<vmem>>, vector<1x128xf32>
    %36 = vector.broadcast %35 : vector<1x128xf32> to vector<256x128xf32>
    %37 = arith.addf %34, %36 : vector<256x128xf32>
    %cst_23 = arith.constant 0.000000e+00 : f32
    %38 = vector.broadcast %cst_23 : f32 to vector<256x128xf32>
    %39 = arith.maximumf %37, %38 : vector<256x128xf32>
    %40 = arith.truncf %39 : vector<256x128xf32> to vector<256x128xbf16>
    %c0_24 = arith.constant 0 : index
    %c0_25 = arith.constant 0 : index
    %41 = vector.load %arg10[%c0_24, %c0_25] : memref<128x128xbf16, #tpu.memory_space<vmem>>, vector<128x128xbf16>
    %cst_26 = arith.constant dense<0.000000e+00> : vector<256x128xf32>
    %42 = tpu.matmul %40, %41, %cst_26 {dimension_numbers = #tpu.dot_dimension_numbers<[1], [0], [0], [1], [0, 0, 1, 1], [], []>} : vector<256x128xbf16>, vector<128x128xbf16>, vector<256x128xf32> -> vector<256x128xf32>
    %c0_27 = arith.constant 0 : index
    %c0_28 = arith.constant 0 : index
    %43 = vector.load %arg11[%c0_27, %c0_28] : memref<1x128xf32, #tpu.memory_space<vmem>>, vector<1x128xf32>
    %44 = vector.broadcast %43 : vector<1x128xf32> to vector<256x128xf32>
    %45 = arith.addf %42, %44 : vector<256x128xf32>
    %cst_29 = arith.constant 0.000000e+00 : f32
    %46 = vector.broadcast %cst_29 : f32 to vector<256x128xf32>
    %47 = arith.maximumf %45, %46 : vector<256x128xf32>
    %48 = arith.truncf %47 : vector<256x128xf32> to vector<256x128xbf16>
    %c0_30 = arith.constant 0 : index
    %c0_31 = arith.constant 0 : index
    %49 = vector.load %arg12[%c0_30, %c0_31] : memref<128x64xbf16, #tpu.memory_space<vmem>>, vector<128x64xbf16>
    %cst_32 = arith.constant dense<0.000000e+00> : vector<256x64xf32>
    %50 = tpu.matmul %48, %49, %cst_32 {dimension_numbers = #tpu.dot_dimension_numbers<[1], [0], [0], [1], [0, 0, 1, 1], [], []>} : vector<256x128xbf16>, vector<128x64xbf16>, vector<256x64xf32> -> vector<256x64xf32>
    %c0_33 = arith.constant 0 : index
    %c0_34 = arith.constant 0 : index
    %51 = vector.load %arg13[%c0_33, %c0_34] : memref<1x64xf32, #tpu.memory_space<vmem>>, vector<1x64xf32>
    %52 = vector.broadcast %51 : vector<1x64xf32> to vector<256x64xf32>
    %53 = arith.addf %50, %52 : vector<256x64xf32>
    %54 = tpu.concatenate %53, %24 in 1 : vector<256x64xf32>, vector<256x64xf32> -> vector<256x128xf32>
    %55 = arith.truncf %54 : vector<256x128xf32> to vector<256x128xbf16>
    %c0_35 = arith.constant 0 : index
    %c0_36 = arith.constant 0 : index
    %56 = vector.load %arg14[%c0_35, %c0_36] : memref<256x128xbf16, #tpu.memory_space<vmem>>, vector<256x128xbf16>
    tpu.vector_store %arg14[%c0_35, %c0_36], %55 {strides = array<i32>} : memref<256x128xbf16, #tpu.memory_space<vmem>>, vector<256x128xbf16>,
    return
  }
  func.func @transform_0(%arg0: i32) -> (i32, i32) {
    %c0_i32 = arith.constant 0 : i32
    %c0_i32_0 = arith.constant 0 : i32
    return %arg0, %c0_i32 : i32, i32
  }
  func.func @transform_1(%arg0: i32) -> (i32, i32) {
    %c0_i32 = arith.constant 0 : i32
    %c0_i32_0 = arith.constant 0 : i32
    %c0_i32_1 = arith.constant 0 : i32
    return %c0_i32, %c0_i32_0 : i32, i32
  }
  func.func @transform_2(%arg0: i32) -> (i32, i32) {
    %c0_i32 = arith.constant 0 : i32
    %c0_i32_0 = arith.constant 0 : i32
    %c0_i32_1 = arith.constant 0 : i32
    return %c0_i32, %c0_i32_0 : i32, i32
  }
  func.func @transform_3(%arg0: i32) -> (i32, i32) {
    %c0_i32 = arith.constant 0 : i32
    %c0_i32_0 = arith.constant 0 : i32
    %c0_i32_1 = arith.constant 0 : i32
    return %c0_i32, %c0_i32_0 : i32, i32
  }
  func.func @transform_4(%arg0: i32) -> (i32, i32) {
    %c0_i32 = arith.constant 0 : i32
    %c0_i32_0 = arith.constant 0 : i32
    %c0_i32_1 = arith.constant 0 : i32
    return %c0_i32, %c0_i32_0 : i32, i32
  }
  func.func @transform_5(%arg0: i32) -> (i32, i32) {
    %c0_i32 = arith.constant 0 : i32
    %c0_i32_0 = arith.constant 0 : i32
    %c0_i32_1 = arith.constant 0 : i32
    return %c0_i32, %c0_i32_0 : i32, i32
  }
  func.func @transform_6(%arg0: i32) -> (i32, i32) {
    %c0_i32 = arith.constant 0 : i32
    %c0_i32_0 = arith.constant 0 : i32
    %c0_i32_1 = arith.constant 0 : i32
    return %c0_i32, %c0_i32_0 : i32, i32
  }
  func.func @transform_7(%arg0: i32) -> (i32, i32) {
    %c0_i32 = arith.constant 0 : i32
    %c0_i32_0 = arith.constant 0 : i32
    %c0_i32_1 = arith.constant 0 : i32
    return %c0_i32, %c0_i32_0 : i32, i32
  }
  func.func @transform_8(%arg0: i32) -> (i32, i32) {
    %c0_i32 = arith.constant 0 : i32
    %c0_i32_0 = arith.constant 0 : i32
    %c0_i32_1 = arith.constant 0 : i32
    return %c0_i32, %c0_i32_0 : i32, i32
  }
  func.func @transform_9(%arg0: i32) -> (i32, i32) {
    %c0_i32 = arith.constant 0 : i32
    %c0_i32_0 = arith.constant 0 : i32
    %c0_i32_1 = arith.constant 0 : i32
    return %c0_i32, %c0_i32_0 : i32, i32
  }
  func.func @transform_10(%arg0: i32) -> (i32, i32) {
    %c0_i32 = arith.constant 0 : i32
    %c0_i32_0 = arith.constant 0 : i32
    %c0_i32_1 = arith.constant 0 : i32
    return %c0_i32, %c0_i32_0 : i32, i32
  }
  func.func @transform_11(%arg0: i32) -> (i32, i32) {
    %c0_i32 = arith.constant 0 : i32
    %c0_i32_0 = arith.constant 0 : i32
    %c0_i32_1 = arith.constant 0 : i32
    return %c0_i32, %c0_i32_0 : i32, i32
  }
  func.func @transform_12(%arg0: i32) -> (i32, i32) {
    %c0_i32 = arith.constant 0 : i32
    %c0_i32_0 = arith.constant 0 : i32
    %c0_i32_1 = arith.constant 0 : i32
    return %c0_i32, %c0_i32_0 : i32, i32
  }
  func.func @transform_13(%arg0: i32) -> (i32, i32) {
    %c0_i32 = arith.constant 0 : i32
    %c0_i32_0 = arith.constant 0 : i32
    return %arg0, %c0_i32 : i32, i32
  }
}

</mosaic_0001>

<bundles_post_ra>
// kernel: tpu_custom_call.1
= control target key start
LH: loop header
LB: loop body
LE: loop exit
PB: predicated region body
PF: predicated region fallthrough
CT: control target
= control target key end

     0   :  { %s4403_s0 = inlined_call_operand.hbm [shape: bf16[1024,128], index: 0, kind: input, shape index: {}]   ;;  %s4404_s1 = inlined_call_operand.vmem [shape: bf16[64,128], index: 1, kind: input, shape index: {}]   ;;  %s4405_s2 = inlined_call_operand.hbm [shape: f32[1,128], index: 2, kind: input, shape index: {}]   ;;  %s4406_s3 = inlined_call_operand.vmem [shape: bf16[128,128], index: 3, kind: input, shape index: {}]   ;;  %s4407_s4 = inlined_call_operand.vmem [shape: f32[1,128], index: 4, kind: input, shape index: {}]   ;;  %s4408_s5 = inlined_call_operand.vmem [shape: bf16[128,64], index: 5, kind: input, shape index: {}]   ;;  %s4409_s6 = inlined_call_operand.vmem [shape: f32[1,64], index: 6, kind: input, shape index: {}]   ;;  %s4410_s7 = inlined_call_operand.hbm [shape: bf16[32,128], index: 7, kind: input, shape index: {}]   ;;  %s4411_s8 = inlined_call_operand.vmem [shape: f32[1,128], index: 8, kind: input, shape index: {}]   ;;  %s4412_s9 = inlined_call_operand.vmem [shape: bf16[128,128], index: 9, kind: input, shape index: {}]   ;;  %s4413_s10 = inlined_call_operand.vmem [shape: f32[1,128], index: 10, kind: input, shape index: {}]   ;;  %s4414_s11 = inlined_call_operand.vmem [shape: bf16[128,64], index: 11, kind: input, shape index: {}]   ;;  %s4415_s12 = inlined_call_operand.vmem [shape: f32[1,64], index: 12, kind: input, shape index: {}]   ;;  %s4416_s13 = inlined_call_operand.hbm [shape: bf16[1024,128], index: 13, kind: output, shape index: {}]  }
   0x1   :  { %4425 = sst [smem:[#allocation18_spill]] %s4405_s2 }
   0x2   :  { %4426 = sst [smem:[#allocation19_spill]] %s4410_s7 }
   0x3   :  { %4427 = sst [smem:[#allocation20_spill]] %s4411_s8 }
   0x4   :  { %4428 = sst [smem:[#allocation21_spill]] %s4413_s10 }
   0x5   :  { %4429 = sst [smem:[#allocation22_spill]] %s4415_s12 }
   0x6   :  { %4430 = sst [smem:[#allocation23_spill]] %s4416_s13 }
   0x7   :  { %18 = vsyncpa [#allocation3], 0 }
   0x8   :  { %20 = vsyncpa [#allocation3 + $0x1], 0 }
   0x9   :  { %21 = vsyncpa [#allocation6], 0 }
   0xa   :  { %22 = vsyncpa [#allocation4], 0 }
   0xb   :  { %24 = vsyncpa [#allocation4 + $0x1], 0  ;;  %s3439_s25 = smov 0   ;;  %s3441_s26 = smov 0  }
   0xc   :  { %s3443_s27 = smov 0   ;;  %s3445_s28 = smov 0  }
   0xd LB: > { %4431 = sst [smem:[#allocation12_spill]] %s3348_s25  ;;  %s3460_s29 = sadd.s32 4294967295, %s3360_s28   ;;  %s3360_s28 = sphi %s3445_s28, %s4452_s28   ;;  %s3356_s27 = sphi %s3443_s27, %s4457_s27   ;;  %s3352_s26 = sphi %s3441_s26, %s4456_s26   ;;  %s3348_s25 = sphi %s3439_s25, %s4455_s25  }
   0xe   : > { %4432 = sst [smem:[#allocation13_spill]] %s3356_s27  ;;  %s2555_s30 = sadd.s32 4294967294, %s3360_s28  }
   0xf   : > { %s3464_s14 = sadd.s32 1, %s3360_s28   ;;  %s37_s15 = sadd.s32 1, %s3356_s27 }
  0x10   : > { %4433 = sst [smem:[#allocation14_spill]] %s3464_s14  ;;  %s34_s16 = ssub.s32 %s3360_s28, %s3464_s14 }
  0x11   : > { %p44_p0 = scmp.ne.s32.totalorder %s3356_s27, %s3352_s26  ;;  %p35_p1 = scmp.eq.s32.totalorder %s34_s16, 0 }
  0x12   : > { %p45_p2 = scmp.eq.s32.totalorder %s3360_s28, 0  ;;  %p50_p3 = scmp.ne.s32.totalorder %s3352_s26, %s3348_s25 }
  0x13   : > { %p51_p4 = scmp.eq.s32.totalorder %s3460_s29, 0  ;;  %p326_p7 = scmp.eq.s32.totalorder %s3460_s29, 3 }
  0x14   : > { %s3476_s17 = scalar_select %p35_p1, %s3356_s27, %s37_s15  }
  0x15   : > { %p3478_p5 = por %p45_p2, %p44_p0  ;;  %p3484_p6 = por %p51_p4, %p50_p3 }
  0x16   : > { %4434 = sst [smem:[#allocation15_spill]] %s3476_s17  ;;  %p332_p8 = scmp.eq.s32.totalorder %s2555_s30, 3 }
  0x17   : > { %p2556_p9 = scmp.ge.s32.totalorder %s3360_s28, 1  ;;  %p339_p10 = scmp.lt.s32.totalorder %s3360_s28, 5 }
  0x18   : > { %p3491_p11 = por %p326_p7, %p44_p0  ;;  %p3495_p12 = por %p332_p8, %p50_p3 }
  0x19   : > { %p3499_p13 = pnand %p2556_p9, %p339_p10  ;;  %s4442_s2 = sld [smem:[#allocation18_spill]] }
  0x1a   : > { %s4437_s20 = scalar_select %p3491_p11, 1, 0 }
  0x1b   : > { %s4439_s21 = scalar_select %p3495_p12, 1, 0 }
  0x1c   : > { %4438 = sst [smem:[#allocation16_spill]] %s4437_s20  ;;  %p2990_p1 = pneg %p3499_p13 }
  0x1d   : > { %4440 = sst [smem:[#allocation17_spill]] %s4439_s21  ;;  %s3362_s15 = smov [#allocation5]  }
  0x1e   : > { %s356_s16 = sshll.u32 %s3362_s15, 4  ;;  %p2991_p0 = pnand %p2990_p1, %p51_p4  ;;  %s357_s16 = int_to_ptr.vmem [resolvable:$true] %s356_s16 }
  0x1f   : > { %s354_s30 = sshll.u32 %s4442_s2, 4  ;;  %p3007_p2 = scmp.lt.s32.totalorder %s3360_s28, 4  ;;  %s355_s30 = int_to_ptr.hbm [resolvable:$true] %s354_s30 }
  0x20   : > { %s4443_s7 = sld [smem:[#allocation19_spill]]  ;;  %s3363_s24 = smov [#allocation7]  }
  0x21   : > { %2993 = dma.hbm_to_vmem [thread:$0]  (!%p2991_p0), %s355_s30, 16, %s357_s16, [#allocation6]  }
  0x22   : > { %p3516_p3 = pnand %p3007_p2, %p3478_p5  ;;  %s379_s2 = sshll.u32 %s3363_s24, 4  ;;  %s380_s2 = int_to_ptr.vmem [resolvable:$true] %s379_s2 }
  0x23   : > { %s408_s15 = sand.u32 1, %s3356_s27   ;;  %s3364_s25 = smov 64  }
  0x24   : > { %s3365_s20 = smov 4   ;;  %s2560_s13 = sshll.u32 %s408_s15, 7 }
  0x25   : > { %s2821_s12 = sshll.u32 %s3360_s28, 7  ;;  %s412_s30 = scalar_lea.vmem [#allocation2], %s2560_s13 }
  0x26   : > { %s377_s21 = sshll.u32 %s4443_s7, 4  ;;  %s417_s17 = scalar_lea.hbm %s4403_s0, %s2821_s12  ;;  %s378_s21 = int_to_ptr.hbm [resolvable:$true] %s377_s21 }
  0x27   : > { %2996 = dma.hbm_to_vmem [thread:$0]  (!%p2991_p0), %s378_s21, 256, %s380_s2, [#allocation6], %s3364_s25, %s3364_s25, %s3365_s20  }
  0x28   : > { %s420_s18 = sshll.u32 %s412_s30, 4  ;;  %s418_s16 = sshll.u32 %s417_s17, 4  ;;  %s421_s18 = int_to_ptr.vmem [resolvable:$true] %s420_s18  ;;  %s419_s16 = int_to_ptr.hbm [resolvable:$true] %s418_s16 }
  0x29   : > { %s409_s7 = scalar_lea.sflag [#allocation3], %s408_s15  ;;  %s3260_s8 = sshra.s32 %s419_s16, 4  ;;  %s3261_s8 = int_to_ptr.hbm [resolvable:$true] %s3260_s8 }
  0x2a   : > { %s3262_s24 = scalar_lea.hbm %s3261_s8, 128  ;;  %p3264_p7 = pneg %p3516_p3 }
  0x2b   : > { %p3263_p5 = scmp.ne.s32.totalorder %s3261_s8, %s3262_s24  ;;  %s3267_s27 = scalar_lea.hbm %s4403_s0, 512 }
  0x2c   : > { %p3268_p10 = scmp.lt.s32.totalorder %s3261_s8, %s4403_s0  ;;  %p3269_p1 = scmp.lt.s32.totalorder %s3267_s27, %s3262_s24 }
  0x2d   : > { %p3265_p8 = pnand %p3264_p7, %p3263_p5 }
  0x2e   : > { %p3270_p0 = por %p3269_p1, %p3268_p10 }
  0x2f   : > { %p3266_p9 = pneg %p3265_p8 }
  0x31   : > { %p3271_p2 = pnand %p3270_p0, %p3266_p9 }
  0x33   : > { %3274 = shalt.err (!%p3271_p2)
}
  0x34   : > { %3000 = dma.hbm_to_vmem [thread:$0]  (!%p3516_p3), %s419_s16, 2048, %s421_s18, %s409_s7, %s3364_s25, %s3364_s25, %s3365_s20  }
  0x35   : > { %432 = sbr.rel (%p3499_p13) target bundleno = 1662 (0x67e), region = 72  ;;  %s3538_s13 = sand.u32 (!%p3499_p13), 1, %s3352_s26  }
  0x36   : > { %s2564_s15 = sshll.u32 (!%p3499_p13), %s3538_s13, 7  ;;  %s435_s14 = scalar_lea.sflag (!%p3499_p13), [#allocation3], %s3538_s13 }
  0x37   : > { %s3544_s8 = scalar_lea.vmem (!%p3499_p13), [#allocation2], %s2564_s15 }
  0x3a   : > { %3335 = dma.done.wait (%p3484_p6), %s435_s14, 2048  }
  0x3b   : > { %3337 = vsyncadd (%p3484_p6), %s435_s14, 4294965248 }
  0x3c   : > { %3339 = dma.done.wait (%p51_p4), [#allocation6], 272  }
  0x3d   : > { %3341 = vsyncadd (%p51_p4), [#allocation6], 4294967024  ;;  %v2841_v0 = vld [vmem:[%s4404_s1 + $0x18] sm:$0xff]  ;;  %v2840_v1 = vld [vmem:[%s4404_s1 + $0x10] sm:$0xff]  ;;  %vm675_vm0 = vcmask 523264   ;;  %s3366_s16 = smov 32  }
  0x3e   : > { %728 = vmatpush.bf16.msra.mxu0 %v2841_v0  ;;  %2972 = vmatpush.bf16.msra.mxu1 %v2841_v0  ;;  %v2839_v2 = vld [vmem:[%s4404_s1 + $0x8] sm:$0xff]  ;;  %v2838_v3 = vld [vmem:[%s4404_s1] sm:$0xff]  ;;  %v2849_v4 = vld [vmem:[%s4406_s3 + $0x38] sm:$0xff]  ;;  %s3367_s24 = smov 64   ;;  %vm1675_vm1 = vcmask 261120   ;;  %s4445_s12 = sld [smem:[#allocation20_spill]] }
  0x3f   : > { %v2822_v5 = vld [vmem:[%s3544_s8] sm:$0xff]  ;;  %v2831_v6 = vld [vmem:[%s3544_s8 + $0x48] sm:$0xff]  ;;  %v2848_v7 = vld [vmem:[%s4406_s3 + $0x30] sm:$0xff]  ;;  %s4278_s25 = scalar_lea.vmem [#allocation8], %s2564_s15  ;;  %s2876_s15 = sshll.u32 %s3460_s29, 7 }
  0x40   : > { %v2823_v8 = vld [vmem:[%s3544_s8 + $0x8] sm:$0xff]  ;;  %v2832_v9 = vld [vmem:[%s3544_s8 + $0x50] sm:$0xff]  ;;  %v2833_v12 = vld [vmem:[%s3544_s8 + $0x58] sm:$0xff]  ;;  %s4448_s19 = sld [smem:[#allocation23_spill]]  ;;  %s2460_s23 = sshll.u32 %s4278_s25, 4  ;;  %s2461_s23 = int_to_ptr.vmem [resolvable:$true] %s2460_s23 }
  0x41   : > { %v2847_v10 = vld [vmem:[%s4406_s3 + $0x28] sm:$0xff]  ;;  %v2824_v11 = vld [vmem:[%s3544_s8 + $0x10] sm:$0xff]  ;;  %v2846_v13 = vld [vmem:[%s4406_s3 + $0x20] sm:$0xff]  ;;  %s2448_s29 = scalar_lea.sflag [#allocation4], %s3538_s13 }
  0x42   : > { %729 = vmatpush.bf16.msra.mxu0 %v2840_v1  ;;  %2973 = vmatpush.bf16.msra.mxu1 %v2840_v1  ;;  %v2825_v14 = vld [vmem:[%s3544_s8 + $0x18] sm:$0xff]  ;;  %v2834_v15 = vld [vmem:[%s3544_s8 + $0x60] sm:$0xff]  ;;  %v2835_v18 = vld [vmem:[%s3544_s8 + $0x68] sm:$0xff] }
  0x43   : > { %v2845_v16 = vld [vmem:[%s4406_s3 + $0x18] sm:$0xff]  ;;  %v2826_v17 = vld [vmem:[%s3544_s8 + $0x20] sm:$0xff]  ;;  %v2844_v19 = vld [vmem:[%s4406_s3 + $0x10] sm:$0xff] }
  0x44   : > { %v2827_v20 = vld [vmem:[%s3544_s8 + $0x28] sm:$0xff]  ;;  %v2836_v21 = vld [vmem:[%s3544_s8 + $0x70] sm:$0xff]  ;;  %v2837_v24 = vld [vmem:[%s3544_s8 + $0x78] sm:$0xff] }
  0x45   : > { %v2843_v22 = vld [vmem:[%s4406_s3 + $0x8] sm:$0xff]  ;;  %v2828_v23 = vld [vmem:[%s3544_s8 + $0x30] sm:$0xff]  ;;  %v2842_v25 = vld [vmem:[%s4406_s3] sm:$0xff] }
  0x46   : > { %730 = vmatpush.bf16.msra.mxu0 %v2839_v2  ;;  %2974 = vmatpush.bf16.msra.mxu1 %v2839_v2  ;;  %v2829_v26 = vld [vmem:[%s3544_s8 + $0x38] sm:$0xff]  ;;  %v2830_v27 = vld [vmem:[%s3544_s8 + $0x40] sm:$0xff]  ;;  %s2459_s22 = scalar_lea.hbm %s4448_s19, %s2876_s15  ;;  %s3310_s10 = scalar_lea.hbm %s4448_s19, 512 }
  0x47   : > { %v3623_v30 = vld [vmem:[#allocation5] ss:$0 sm:$0xff]  ;;  %s2462_s30 = sshll.u32 %s2459_s22, 4  ;;  %s2463_s30 = int_to_ptr.hbm [resolvable:$true] %s2462_s30 }
  0x48   : > { %s3304_s18 = sshra.s32 %s2463_s30, 4  ;;  %s3305_s18 = int_to_ptr.hbm [resolvable:$true] %s3304_s18 }
  0x49   : > { %p3311_p3 = scmp.lt.s32.totalorder %s3305_s18, %s4448_s19 }
  0x4a   : > { %731 = vmatpush.bf16.msra.mxu0 %v2838_v3  ;;  %2975 = vmatpush.bf16.msra.mxu1 %v2838_v3 }
  0x4d   : > { %2648 = vmatmul.msk.bf16.vlgmr.msra.gmra.mxu0 %vm675_vm0, %v2822_v5  ;;  %2657 = vmatmul.msk.bf16.vlgmr.msra.gmra.mxu1 %vm675_vm0, %v2831_v6 }
  0x4e   : > { %929 = vmatpush.bf16.msrb.mxu1 %v2849_v4 }
  0x52   : > { %930 = vmatpush.bf16.msrb.mxu1 %v2848_v7 }
  0x56   : > { %931 = vmatpush.bf16.msrb.mxu1 %v2847_v10 }
  0x5a   : > { %932 = vmatpush.bf16.msrb.mxu1 %v2846_v13  ;;  %v2857_v13 = vld [vmem:[%s4408_s5 + $0x38] sm:$0xff] }
  0x5b   : > { %1134 = vmatpush.bf16.msra.mxu2 %v2857_v13 }
  0x5d   : > { %2649 = vmatmul.msk.bf16.gmra.mxu0 %vm675_vm0, %v2823_v8  ;;  %2658 = vmatmul.msk.bf16.gmra.mxu1 %vm675_vm0, %v2832_v9 }
  0x5e   : > { %933 = vmatpush.bf16.msrb.mxu1 %v2845_v16 }
  0x62   : > { %934 = vmatpush.bf16.msrb.mxu1 %v2844_v19 }
  0x66   : > { %935 = vmatpush.bf16.msrb.mxu1 %v2843_v22  ;;  %v2854_v22 = vld [vmem:[%s4408_s5 + $0x20] sm:$0xff] }
  0x6a   : > { %936 = vmatpush.bf16.msrb.mxu1 %v2842_v25 }
  0x6d   : > { %2650 = vmatmul.msk.bf16.gmra.mxu0 %vm675_vm0, %v2824_v11  ;;  %2659 = vmatmul.msk.bf16.gmra.mxu1 %vm675_vm0, %v2833_v12 }
  0x7d   : > { %2651 = vmatmul.msk.bf16.gmra.mxu0 %vm675_vm0, %v2825_v14  ;;  %2660 = vmatmul.msk.bf16.gmra.mxu1 %vm675_vm0, %v2834_v15 }
  0x8d   : > { %2652 = vmatmul.msk.bf16.gmra.mxu0 %vm675_vm0, %v2826_v17  ;;  %2661 = vmatmul.msk.bf16.gmra.mxu1 %vm675_vm0, %v2835_v18  ;;  %v2856_v18 = vld [vmem:[%s4408_s5 + $0x30] sm:$0xff] }
  0x8e   : > { %1135 = vmatpush.bf16.msra.mxu2 %v2856_v18 }
  0x9d   : > { %2653 = vmatmul.msk.bf16.gmra.mxu0 %vm675_vm0, %v2827_v20  ;;  %2662 = vmatmul.msk.bf16.gmra.mxu1 %vm675_vm0, %v2836_v21  ;;  %v2855_v20 = vld [vmem:[%s4408_s5 + $0x28] sm:$0xff] }
  0x9e   : > { %1136 = vmatpush.bf16.msra.mxu2 %v2855_v20 }
  0xa2   : > { %1137 = vmatpush.bf16.msra.mxu2 %v2854_v22 }
  0xad   : > { %2654 = vmatmul.msk.bf16.gmra.mxu0 %vm675_vm0, %v2828_v23  ;;  %2663 = vmatmul.msk.bf16.gmra.mxu1 %vm675_vm0, %v2837_v24 }
  0xbd   : > { %2655 = vmatmul.msk.bf16.gmra.mxu0 %vm675_vm0, %v2829_v26  ;;  %v2853_v26 = vld [vmem:[%s4408_s5 + $0x18] sm:$0xff] }
  0xbe   : > { %1138 = vmatpush.bf16.msra.mxu2 %v2853_v26 }
  0xca   : > { %v733_v28 = vpop.f32.mrf.mxu0  ;;  %v3621_v29 = vpop.f32.mrf.mxu1 }
  0xcb   : > { %v734_v31 = vadd.f32 %v3623_v30, %v733_v28 }
  0xcd   : > { %2656 = vmatmul.msk.bf16.gmra.mxu0 %vm675_vm0, %v2830_v27  ;;  %v813_v34 = vmax.f32 %v734_v31, 0.0 }
  0xd2   : > { %v735_v32 = vpop.f32.mrf.mxu0  ;;  %v3628_v36 = vpop.f32.mrf.mxu1 }
  0xd3   : > { %v736_v33 = vadd.f32 %v3623_v30, %v735_v32  ;;  %v2852_v32 = vld [vmem:[%s4408_s5 + $0x10] sm:$0xff] }
  0xd4   : > { %1139 = vmatpush.bf16.msra.mxu2 %v2852_v32 }
  0xd5   : > { %v814_v35 = vmax.f32 %v736_v33, 0.0 }
  0xd7   : > { %v845_v37 = vpack.c.bf16 %v814_v35, %v813_v34  ;;  %v2851_v35 = vld [vmem:[%s4408_s5 + $0x8] sm:$0xff] }
  0xd8   : > { %1140 = vmatpush.bf16.msra.mxu2 %v2851_v35 }
  0xd9   : > { %937 = vmatmul.bf16.vlgmr.msrb.gmra.mxu1 %v845_v37  ;;  %v2850_v37 = vld [vmem:[%s4408_s5] sm:$0xff] }
  0xda   : > { %v738_v38 = vpop.f32.mrf.mxu0  ;;  %v3630_v39 = vpop.f32.mrf.mxu1 }
  0xdb   : > { %v739_v40 = vadd.f32 %v3623_v30, %v738_v38 }
  0xdc   : > { %1141 = vmatpush.bf16.msra.mxu2 %v2850_v37 }
  0xdd   : > { %v815_v43 = vmax.f32 %v739_v40, 0.0 }
  0xe2   : > { %v740_v41 = vpop.f32.mrf.mxu0  ;;  %v3634_v47 = vpop.f32.mrf.mxu1 }
  0xe3   : > { %v741_v42 = vadd.f32 %v3623_v30, %v740_v41 }
  0xe5   : > { %v816_v44 = vmax.f32 %v741_v42, 0.0 }
  0xe7   : > { %v846_v45 = vpack.c.bf16 %v816_v44, %v815_v43 }
  0xe9   : > { %942 = vmatmul.bf16.gmra.mxu1 %v846_v45 }
  0xea   : > { %v743_v46 = vpop.f32.mrf.mxu0  ;;  %v3638_v51 = vpop.f32.mrf.mxu1 }
  0xeb   : > { %v744_v48 = vadd.f32 %v3623_v30, %v743_v46 }
  0xed   : > { %v817_v52 = vmax.f32 %v744_v48, 0.0 }
  0xf2   : > { %v745_v49 = vpop.f32.mrf.mxu0  ;;  %v3640_v56 = vpop.f32.mrf.mxu1 }
  0xf3   : > { %v746_v50 = vadd.f32 %v3623_v30, %v745_v49 }
  0xf5   : > { %v818_v53 = vmax.f32 %v746_v50, 0.0 }
  0xf7   : > { %v847_v54 = vpack.c.bf16 %v818_v53, %v817_v52 }
  0xf9   : > { %947 = vmatmul.bf16.gmra.mxu1 %v847_v54 }
  0xfa   : > { %v748_v55 = vpop.f32.mrf.mxu0  ;;  %v3644_v63 = vpop.f32.mrf.mxu1 }
  0xfb   : > { %v749_v57 = vadd.f32 %v3623_v30, %v748_v55 }
  0xfd   : > { %v819_v60 = vmax.f32 %v749_v57, 0.0 }
 0x102   : > { %v750_v58 = vpop.f32.mrf.mxu0  ;;  %v3647_v3 = vpop.f32.mrf.mxu1 }
 0x103   : > { %v751_v59 = vadd.f32 %v3623_v30, %v750_v58  ;;  %v3697_v58 = vld [vmem:[%s4407_s4] ss:$0 sm:$0xff] }
 0x105   : > { %v820_v61 = vmax.f32 %v751_v59, 0.0 }
 0x107   : > { %v848_v62 = vpack.c.bf16 %v820_v61, %v819_v60  ;;  %v779_v61 = vadd.f32 %v3623_v30, %v3621_v29  ;;  %v784_v29 = vadd.f32 %v3623_v30, %v3630_v39  ;;  %v789_v39 = vadd.f32 %v3623_v30, %v3638_v51 }
 0x108   : > { %v794_v51 = vadd.f32 %v3623_v30, %v3644_v63 }
 0x109   : > { %952 = vmatmul.bf16.gmra.mxu1 %v848_v62  ;;  %v781_v62 = vadd.f32 %v3623_v30, %v3628_v36  ;;  %v786_v36 = vadd.f32 %v3623_v30, %v3634_v47  ;;  %v791_v47 = vadd.f32 %v3623_v30, %v3640_v56  ;;  %v796_v56 = vadd.f32 %v3623_v30, %v3647_v3 }
 0x10a   : > { %v753_v0 = vpop.f32.mrf.mxu0  ;;  %v3650_v9 = vpop.f32.mrf.mxu1 }
 0x10b   : > { %v754_v1 = vadd.f32 %v3623_v30, %v753_v0  ;;  %v799_v63 = vadd.f32 %v3623_v30, %v3650_v9 }
 0x10d   : > { %v821_v5 = vmax.f32 %v754_v1, 0.0 }
 0x112   : > { %v755_v2 = vpop.f32.mrf.mxu0  ;;  %v3657_v16 = vpop.f32.mrf.mxu1 }
 0x113   : > { %v756_v4 = vadd.f32 %v3623_v30, %v755_v2  ;;  %v801_v3 = vadd.f32 %v3623_v30, %v3657_v16 }
 0x115   : > { %v822_v6 = vmax.f32 %v756_v4, 0.0  ;;  %v831_v4 = vmax.f32 %v779_v61, 0.0 }
 0x117   : > { %v849_v7 = vpack.c.bf16 %v822_v6, %v821_v5  ;;  %v832_v5 = vmax.f32 %v781_v62, 0.0 }
 0x119   : > { %957 = vmatmul.bf16.gmra.mxu1 %v849_v7 }
 0x11a   : > { %v758_v8 = vpop.f32.mrf.mxu0  ;;  %v3665_v21 = vpop.f32.mrf.mxu1 }
 0x11b   : > { %v759_v10 = vadd.f32 %v3623_v30, %v758_v8  ;;  %v854_v8 = vpack.c.bf16 %v832_v5, %v831_v4  ;;  %v804_v9 = vadd.f32 %v3623_v30, %v3665_v21 }
 0x11d   : > { %v823_v14 = vmax.f32 %v759_v10, 0.0 }
 0x122   : > { %v760_v11 = vpop.f32.mrf.mxu0  ;;  %v3678_v33 = vpop.f32.mrf.mxu1 }
 0x123   : > { %v761_v12 = vadd.f32 %v3623_v30, %v760_v11  ;;  %v806_v16 = vadd.f32 %v3623_v30, %v3678_v33 }
 0x125   : > { %v824_v15 = vmax.f32 %v761_v12, 0.0 }
 0x127   : > { %v850_v17 = vpack.c.bf16 %v824_v15, %v823_v14  ;;  %v833_v15 = vmax.f32 %v784_v29, 0.0 }
 0x129   : > { %962 = vmatmul.bf16.gmra.mxu1 %v850_v17  ;;  %v834_v17 = vmax.f32 %v786_v36, 0.0 }
 0x12a   : > { %v763_v19 = vpop.f32.mrf.mxu0  ;;  %v3688_v42 = vpop.f32.mrf.mxu1 }
 0x12b   : > { %v764_v23 = vadd.f32 %v3623_v30, %v763_v19  ;;  %v855_v20 = vpack.c.bf16 %v834_v17, %v833_v15  ;;  %v809_v21 = vadd.f32 %v3623_v30, %v3688_v42 }
 0x12d   : > { %v825_v27 = vmax.f32 %v764_v23, 0.0  ;;  %v843_v15 = vmax.f32 %v809_v21, 0.0 }
 0x132   : > { %v765_v24 = vpop.f32.mrf.mxu0  ;;  %v3690_v48 = vpop.f32.mrf.mxu1 }
 0x133   : > { %v766_v25 = vadd.f32 %v3623_v30, %v765_v24  ;;  %v811_v33 = vadd.f32 %v3623_v30, %v3690_v48 }
 0x135   : > { %v826_v28 = vmax.f32 %v766_v25, 0.0  ;;  %v844_v17 = vmax.f32 %v811_v33, 0.0 }
 0x137   : > { %v851_v31 = vpack.c.bf16 %v826_v28, %v825_v27  ;;  %v835_v27 = vmax.f32 %v789_v39, 0.0  ;;  %v836_v28 = vmax.f32 %v791_v47, 0.0 }
 0x139   : > { %967 = vmatmul.bf16.gmra.mxu1 %v851_v31 }
 0x13a   : > { %v768_v34 = vpop.f32.mrf.mxu0 }
 0x13b   : > { %v769_v38 = vadd.f32 %v3623_v30, %v768_v34  ;;  %v856_v34 = vpack.c.bf16 %v836_v28, %v835_v27 }
 0x13d   : > { %v827_v43 = vmax.f32 %v769_v38, 0.0 }
 0x142   : > { %v770_v40 = vpop.f32.mrf.mxu0 }
 0x143   : > { %v771_v41 = vadd.f32 %v3623_v30, %v770_v40 }
 0x145   : > { %v828_v44 = vmax.f32 %v771_v41, 0.0 }
 0x147   : > { %v852_v45 = vpack.c.bf16 %v828_v44, %v827_v43  ;;  %v837_v43 = vmax.f32 %v794_v51, 0.0  ;;  %v838_v44 = vmax.f32 %v796_v56, 0.0 }
 0x149   : > { %972 = vmatmul.bf16.gmra.mxu1 %v852_v45 }
 0x14a   : > { %v773_v46 = vpop.f32.mrf.mxu0 }
 0x14b   : > { %v774_v49 = vadd.f32 %v3623_v30, %v773_v46 }
 0x14d   : > { %v829_v53 = vmax.f32 %v774_v49, 0.0  ;;  %v857_v49 = vpack.c.bf16 %v838_v44, %v837_v43 }
 0x152   : > { %v775_v50 = vpop.f32.mrf.mxu0 }
 0x153   : > { %v776_v52 = vadd.f32 %v3623_v30, %v775_v50 }
 0x155   : > { %v830_v54 = vmax.f32 %v776_v52, 0.0 }
 0x156   : > { %v938_v55 = vpop.f32.mrf.mxu1 }
 0x157   : > { %v853_v57 = vpack.c.bf16 %v830_v54, %v829_v53  ;;  %v939_v59 = vadd.f32 %v3697_v58, %v938_v55 }
 0x159   : > { %977 = vmatmul.bf16.gmra.mxu1 %v853_v57  ;;  %v1018_v1 = vmax.f32 %v939_v59, 0.0  ;;  %v839_v57 = vmax.f32 %v799_v63, 0.0  ;;  %v840_v59 = vmax.f32 %v801_v3, 0.0 }
 0x15b   : > { %v858_v62 = vpack.c.bf16 %v840_v59, %v839_v57 }
 0x15e   : > { %v940_v60 = vpop.f32.mrf.mxu1 }
 0x15f   : > { %v941_v0 = vadd.f32 %v3697_v58, %v940_v60 }
 0x161   : > { %v1019_v2 = vmax.f32 %v941_v0, 0.0 }
 0x163   : > { %v1050_v6 = vpack.c.bf16 %v1019_v2, %v1018_v1 }
 0x165   : > { %1142 = vmatmul.bf16.vlgmr.msra.gmra.mxu2 %v1050_v6  ;;  %v841_v6 = vmax.f32 %v804_v9, 0.0 }
 0x166   : > { %v943_v7 = vpop.f32.mrf.mxu1 }
 0x167   : > { %v944_v10 = vadd.f32 %v3697_v58, %v943_v7  ;;  %v842_v7 = vmax.f32 %v806_v16, 0.0 }
 0x169   : > { %982 = vmatmul.bf16.gmra.mxu1 %v854_v8  ;;  %v1020_v13 = vmax.f32 %v944_v10, 0.0 }
 0x16e   : > { %v945_v11 = vpop.f32.mrf.mxu1 }
 0x16f   : > { %v946_v12 = vadd.f32 %v3697_v58, %v945_v11  ;;  %v859_v11 = vpack.c.bf16 %v842_v7, %v841_v6 }
 0x171   : > { %v1021_v14 = vmax.f32 %v946_v12, 0.0 }
 0x173   : > { %v1051_v18 = vpack.c.bf16 %v1021_v14, %v1020_v13 }
 0x175   : > { %1147 = vmatmul.bf16.gmra.mxu2 %v1051_v18 }
 0x176   : > { %v948_v19 = vpop.f32.mrf.mxu1 }
 0x177   : > { %v949_v22 = vadd.f32 %v3697_v58, %v948_v19 }
 0x179   : > { %987 = vmatmul.bf16.gmra.mxu1 %v855_v20  ;;  %v1022_v25 = vmax.f32 %v949_v22, 0.0  ;;  %v860_v20 = vpack.c.bf16 %v844_v17, %v843_v15 }
 0x17e   : > { %v950_v23 = vpop.f32.mrf.mxu1 }
 0x17f   : > { %v951_v24 = vadd.f32 %v3697_v58, %v950_v23 }
 0x181   : > { %v1023_v26 = vmax.f32 %v951_v24, 0.0 }
 0x183   : > { %v1052_v31 = vpack.c.bf16 %v1023_v26, %v1022_v25 }
 0x185   : > { %1152 = vmatmul.bf16.gmra.mxu2 %v1052_v31 }
 0x186   : > { %v953_v32 = vpop.f32.mrf.mxu1 }
 0x187   : > { %v954_v35 = vadd.f32 %v3697_v58, %v953_v32  ;;  %v3748_v32 = vld [vmem:[%s4409_s6] ss:$0 sm:$0xff] }
 0x189   : > { %992 = vmatmul.bf16.gmra.mxu1 %v856_v34  ;;  %v1024_v40 = vmax.f32 %v954_v35, 0.0 }
 0x18e   : > { %v955_v37 = vpop.f32.mrf.mxu1 }
 0x18f   : > { %v956_v38 = vadd.f32 %v3697_v58, %v955_v37 }
 0x191   : > { %v1025_v41 = vmax.f32 %v956_v38, 0.0 }
 0x193   : > { %v1053_v45 = vpack.c.bf16 %v1025_v41, %v1024_v40 }
 0x195   : > { %1157 = vmatmul.bf16.gmra.mxu2 %v1053_v45 }
 0x196   : > { %v958_v46 = vpop.f32.mrf.mxu1 }
 0x197   : > { %v959_v50 = vadd.f32 %v3697_v58, %v958_v46 }
 0x199   : > { %997 = vmatmul.bf16.gmra.mxu1 %v857_v49  ;;  %v1026_v54 = vmax.f32 %v959_v50, 0.0 }
 0x19e   : > { %v960_v52 = vpop.f32.mrf.mxu1 }
 0x19f   : > { %v961_v53 = vadd.f32 %v3697_v58, %v960_v52 }
 0x1a1   : > { %v1027_v55 = vmax.f32 %v961_v53, 0.0 }
 0x1a3   : > { %v1054_v60 = vpack.c.bf16 %v1027_v55, %v1026_v54 }
 0x1a5   : > { %1162 = vmatmul.bf16.gmra.mxu2 %v1054_v60 }
 0x1a6   : > { %v963_v61 = vpop.f32.mrf.mxu1 }
 0x1a7   : > { %v964_v0 = vadd.f32 %v3697_v58, %v963_v61 }
 0x1a9   : > { %1002 = vmatmul.bf16.gmra.mxu1 %v858_v62  ;;  %v1028_v4 = vmax.f32 %v964_v0, 0.0 }
 0x1ae   : > { %v965_v1 = vpop.f32.mrf.mxu1 }
 0x1af   : > { %v966_v2 = vadd.f32 %v3697_v58, %v965_v1 }
 0x1b1   : > { %v1029_v5 = vmax.f32 %v966_v2, 0.0 }
 0x1b3   : > { %v1055_v8 = vpack.c.bf16 %v1029_v5, %v1028_v4 }
 0x1b5   : > { %1167 = vmatmul.bf16.gmra.mxu2 %v1055_v8 }
 0x1b6   : > { %v968_v10 = vpop.f32.mrf.mxu1 }
 0x1b7   : > { %v969_v29 = vadd.f32 %v3697_v58, %v968_v10 }
 0x1b9   : > { %1007 = vmatmul.bf16.gmra.mxu1 %v859_v11  ;;  %v1030_v13 = vmax.f32 %v969_v29, 0.0 }
 0x1be   : > { %v970_v36 = vpop.f32.mrf.mxu1 }
 0x1bf   : > { %v971_v12 = vadd.f32 %v3697_v58, %v970_v36 }
 0x1c1   : > { %v1031_v14 = vmax.f32 %v971_v12, 0.0 }
 0x1c3   : > { %v1056_v18 = vpack.c.bf16 %v1031_v14, %v1030_v13 }
 0x1c5   : > { %1172 = vmatmul.bf16.gmra.mxu2 %v1056_v18 }
 0x1c6   : > { %v973_v19 = vpop.f32.mrf.mxu1 }
 0x1c7   : > { %v974_v22 = vadd.f32 %v3697_v58, %v973_v19 }
 0x1c9   : > { %1012 = vmatmul.bf16.gmra.mxu1 %v860_v20  ;;  %v1032_v42 = vmax.f32 %v974_v22, 0.0 }
 0x1ce   : > { %v975_v23 = vpop.f32.mrf.mxu1 }
 0x1cf   : > { %v976_v39 = vadd.f32 %v3697_v58, %v975_v23 }
 0x1d1   : > { %v1033_v47 = vmax.f32 %v976_v39, 0.0 }
 0x1d3   : > { %v1057_v24 = vpack.c.bf16 %v1033_v47, %v1032_v42 }
 0x1d5   : > { %1177 = vmatmul.bf16.gmra.mxu2 %v1057_v24 }
 0x1d6   : > { %v978_v30 = vpop.f32.mrf.mxu1 }
 0x1d7   : > { %v979_v48 = vadd.f32 %v3697_v58, %v978_v30 }
 0x1d9   : > { %v1034_v27 = vmax.f32 %v979_v48, 0.0 }
 0x1de   : > { %v980_v25 = vpop.f32.mrf.mxu1 }
 0x1df   : > { %v981_v26 = vadd.f32 %v3697_v58, %v980_v25 }
 0x1e1   : > { %v1035_v28 = vmax.f32 %v981_v26, 0.0 }
 0x1e3   : > { %v1058_v31 = vpack.c.bf16 %v1035_v28, %v1034_v27 }
 0x1e5   : > { %1182 = vmatmul.bf16.gmra.mxu2 %v1058_v31 }
 0x1e6   : > { %v983_v34 = vpop.f32.mrf.mxu1 }
 0x1e7   : > { %v984_v56 = vadd.f32 %v3697_v58, %v983_v34 }
 0x1e8   : > { %v1143_v35 = vpop.f32.mrf.mxu2 }
 0x1e9   : > { %v3751_v37 = vadd.f32 %v3748_v32, %v1143_v35  ;;  %v1036_v44 = vmax.f32 %v984_v56, 0.0 }
 0x1eb   : > { %v1223_v51 = vmul.f32 0.5, %v3751_v37 }
 0x1ed   : > { %v1255_v38 = vmul.f32 1.442695, %v1223_v51 }
 0x1ee   : > { %v985_v40 = vpop.f32.mrf.mxu1 }
 0x1ef   : > { %3136 = vpow2.f32 %v1255_v38  ;;  %v986_v41 = vadd.f32 %v3697_v58, %v985_v40 }
 0x1f0   : > { %v1145_v43 = vpop.f32.mrf.mxu2 }
 0x1f1   : > { %v1037_v45 = vmax.f32 %v986_v41, 0.0  ;;  %v3757_v46 = vadd.f32 %v3748_v32, %v1145_v43 }
 0x1f3   : > { %v1224_v49 = vmul.f32 0.5, %v3757_v46  ;;  %v1059_v50 = vpack.c.bf16 %v1037_v45, %v1036_v44 }
 0x1f5   : > { %v3137_v52 = vpop.eup %3136  ;;  %v1257_v63 = vmul.f32 1.442695, %v1224_v49  ;;  %1187 = vmatmul.bf16.gmra.mxu2 %v1059_v50 }
 0x1f6   : > { %v988_v3 = vpop.f32.mrf.mxu1  ;;  %1351 = vrot.lane.b32.xlu0 %v3137_v52, %s3366_s16 }
 0x1f7   : > { %3138 = vpow2.f32 %v1257_v63  ;;  %v989_v59 = vadd.f32 %v3697_v58, %v988_v3 }
 0x1f8   : > { %v1148_v53 = vpop.f32.mrf.mxu2 }
 0x1f9   : > { %v3762_v54 = vadd.f32 %v3748_v32, %v1148_v53  ;;  %v1038_v1 = vmax.f32 %v989_v59, 0.0 }
 0x1fb   : > { %v1225_v55 = vmul.f32 0.5, %v3762_v54 }
 0x1fd   : > { %v3139_v57 = vpop.eup %3138  ;;  %v1259_v60 = vmul.f32 1.442695, %v1225_v55 }
 0x1fe   : > { %v990_v61 = vpop.f32.mrf.mxu1  ;;  %1353 = vrot.lane.b32.xlu0 %v3139_v57, %s3366_s16 }
 0x1ff   : > { %3140 = vpow2.f32 %v1259_v60  ;;  %v991_v62 = vadd.f32 %v3697_v58, %v990_v61 }
 0x200   : > { %v1150_v0 = vpop.f32.mrf.mxu2 }
 0x201   : > { %v1039_v9 = vmax.f32 %v991_v62, 0.0  ;;  %v3769_v16 = vadd.f32 %v3748_v32, %v1150_v0 }
 0x203   : > { %v1226_v2 = vmul.f32 0.5, %v3769_v16  ;;  %v1060_v4 = vpack.c.bf16 %v1039_v9, %v1038_v1 }
 0x205   : > { %v3141_v5 = vpop.eup %3140  ;;  %v1261_v6 = vmul.f32 1.442695, %v1226_v2  ;;  %1192 = vmatmul.bf16.gmra.mxu2 %v1060_v4 }
 0x206   : > { %v993_v7 = vpop.f32.mrf.mxu1  ;;  %1355 = vrot.lane.b32.xlu2 %v3141_v5, %s3366_s16 }
 0x207   : > { %3142 = vpow2.f32 %v1261_v6  ;;  %v994_v36 = vadd.f32 %v3697_v58, %v993_v7 }
 0x208   : > { %v1153_v8 = vpop.f32.mrf.mxu2 }
 0x209   : > { %v3774_v10 = vadd.f32 %v3748_v32, %v1153_v8  ;;  %v1040_v14 = vmax.f32 %v994_v36, 0.0 }
 0x20b   : > { %v1227_v11 = vmul.f32 0.5, %v3774_v10 }
 0x20d   : > { %v3143_v29 = vpop.eup %3142  ;;  %v1263_v21 = vmul.f32 1.442695, %v1227_v11 }
 0x20e   : > { %v995_v33 = vpop.f32.mrf.mxu1  ;;  %1357 = vrot.lane.b32.xlu2 %v3143_v29, %s3366_s16 }
 0x20f   : > { %3144 = vpow2.f32 %v1263_v21  ;;  %v996_v12 = vadd.f32 %v3697_v58, %v995_v33  ;;  %v497_v33 = vld [vmem:[%s3544_s8 + $0x8] sm:$0xff]  }
 0x210   : > { %v1155_v13 = vpop.f32.mrf.mxu2 }
 0x211   : > { %v1041_v15 = vmax.f32 %v996_v12, 0.0  ;;  %v3781_v17 = vadd.f32 %v3748_v32, %v1155_v13 }
 0x213   : > { %v1228_v18 = vmul.f32 0.5, %v3781_v17  ;;  %v1061_v19 = vpack.c.bf16 %v1041_v15, %v1040_v14  ;;  %v529_v14 = vunpack.c.l.bf16 %v497_v33 }
 0x215   : > { %v3145_v20 = vpop.eup %3144  ;;  %v1265_v22 = vmul.f32 1.442695, %v1228_v18  ;;  %1197 = vmatmul.bf16.gmra.mxu2 %v1061_v19 }
 0x216   : > { %v998_v23 = vpop.f32.mrf.mxu1  ;;  %1359 = vrot.lane.b32.xlu2 %v3145_v20, %s3366_s16 }
 0x217   : > { %3146 = vpow2.f32 %v1265_v22  ;;  %v999_v30 = vadd.f32 %v3697_v58, %v998_v23  ;;  %v495_v22 = vld [vmem:[%s3544_s8] sm:$0xff]  }
 0x218   : > { %v1158_v39 = vpop.f32.mrf.mxu2 }
 0x219   : > { %v3786_v42 = vadd.f32 %v3748_v32, %v1158_v39  ;;  %v1042_v28 = vmax.f32 %v999_v30, 0.0 }
 0x21b   : > { %v1229_v47 = vmul.f32 0.5, %v3786_v42 }
 0x21d   : > { %v3147_v24 = vpop.eup %3146  ;;  %v1267_v48 = vmul.f32 1.442695, %v1229_v47  ;;  %v527_v47 = vunpack.c.l.bf16 %v495_v22 }
 0x21e   : > { %v1000_v25 = vpop.f32.mrf.mxu1  ;;  %1361 = vrot.lane.b32.xlu0 %v3147_v24, %s3366_s16 }
 0x21f   : > { %3148 = vpow2.f32 %v1267_v48  ;;  %v1001_v26 = vadd.f32 %v3697_v58, %v1000_v25 }
 0x220   : > { %v1160_v27 = vpop.f32.mrf.mxu2 }
 0x221   : > { %v1043_v31 = vmax.f32 %v1001_v26, 0.0  ;;  %v3793_v34 = vadd.f32 %v3748_v32, %v1160_v27 }
 0x223   : > { %v1062_v35 = vpack.c.bf16 %v1043_v31, %v1042_v28  ;;  %v1230_v51 = vmul.f32 0.5, %v3793_v34 }
 0x225   : > { %v3149_v56 = vpop.eup %3148  ;;  %v1269_v38 = vmul.f32 1.442695, %v1230_v51  ;;  %1202 = vmatmul.bf16.gmra.mxu2 %v1062_v35  ;;  %v528_v35 = vunpack.c.h.bf16 %v495_v22  ;;  %v499_v22 = vld [vmem:[%s3544_s8 + $0x10] sm:$0xff]  }
 0x226   : > { %v1003_v40 = vpop.f32.mrf.mxu1  ;;  %1363 = vrot.lane.b32.xlu1 %v3149_v56, %s3366_s16 }
 0x227   : > { %3150 = vpow2.f32 %v1269_v38  ;;  %v1004_v44 = vadd.f32 %v3697_v58, %v1003_v40 }
 0x228   : > { %v3797_v41 = vpop.f32.mrf.mxu2 }
 0x229   : > { %v1044_v52 = vmax.f32 %v1004_v44, 0.0 }
 0x22d   : > { %v3151_v43 = vpop.eup %3150 }
 0x22e   : > { %v1005_v45 = vpop.f32.mrf.mxu1  ;;  %1365 = vrot.lane.b32.xlu2 %v3151_v43, %s3366_s16 }
 0x22f   : > { %v1006_v49 = vadd.f32 %v3697_v58, %v1005_v45  ;;  %v530_v45 = vunpack.c.h.bf16 %v497_v33 }
 0x230   : > { %v3802_v50 = vpop.f32.mrf.mxu2 }
 0x231   : > { %v1045_v63 = vmax.f32 %v1006_v49, 0.0  ;;  %v3861_v33 = vadd.f32 %v3748_v32, %v3802_v50  ;;  %v531_v50 = vunpack.c.l.bf16 %v499_v22 }
 0x233   : > { %v1063_v3 = vpack.c.bf16 %v1045_v63, %v1044_v52 }
 0x235   : > { %1207 = vmatmul.bf16.gmra.mxu2 %v1063_v3 }
 0x236   : > { %v1008_v53 = vpop.f32.mrf.mxu1 }
 0x237   : > { %v1009_v57 = vadd.f32 %v3697_v58, %v1008_v53 }
 0x238   : > { %v3804_v55 = vpop.f32.mrf.mxu2 }
 0x239   : > { %v1046_v62 = vmax.f32 %v1009_v57, 0.0 }
 0x23e   : > { %v1010_v59 = vpop.f32.mrf.mxu1 }
 0x23f   : > { %v1011_v60 = vadd.f32 %v3697_v58, %v1010_v59 }
 0x240   : > { %v3808_v61 = vpop.f32.mrf.mxu2 }
 0x241   : > { %v1047_v0 = vmax.f32 %v1011_v60, 0.0 }
 0x243   : > { %v1064_v1 = vpack.c.bf16 %v1047_v0, %v1046_v62 }
 0x245   : > { %1212 = vmatmul.bf16.gmra.mxu2 %v1064_v1 }
 0x246   : > { %v1013_v9 = vpop.f32.mrf.mxu1 }
 0x247   : > { %v1014_v4 = vadd.f32 %v3697_v58, %v1013_v9 }
 0x248   : > { %v3810_v2 = vpop.f32.mrf.mxu2 }
 0x249   : > { %v1048_v8 = vmax.f32 %v1014_v4, 0.0 }
 0x24e   : > { %v1015_v5 = vpop.f32.mrf.mxu1 }
 0x24f   : > { %v1016_v6 = vadd.f32 %v3697_v58, %v1015_v5 }
 0x250   : > { %v3814_v7 = vpop.f32.mrf.mxu2 }
 0x251   : > { %v1049_v11 = vmax.f32 %v1016_v6, 0.0 }
 0x253   : > { %v1065_v29 = vpack.c.bf16 %v1049_v11, %v1048_v8 }
 0x255   : > { %1217 = vmatmul.bf16.gmra.mxu2 %v1065_v29 }
 0x258   : > { %v1178_v36 = vpop.f32.mrf.mxu2 }
 0x259   : > { %v3817_v21 = vadd.f32 %v3748_v32, %v1178_v36 }
 0x25b   : > { %v1237_v12 = vmul.f32 0.5, %v3817_v21 }
 0x25d   : > { %v1283_v13 = vmul.f32 1.442695, %v1237_v12 }
 0x25f   : > { %3152 = vpow2.f32 %v1283_v13 }
 0x260   : > { %v1180_v15 = vpop.f32.mrf.mxu2  ;;  %v1356_v18 = vpop.permute.xlu2 %1355 }
 0x261   : > { %v3822_v58 = vadd.f32 %v3748_v32, %v1180_v15  ;;  %v1449_v19 = vmul.f32 %v1356_v18, %v529_v14  ;;  %v1232_v15 = vmul.f32 0.5, %v3861_v33 }
 0x263   : > { %v1238_v20 = vmul.f32 0.5, %v3822_v58  ;;  %1515 = vrot.lane.b32.xlu2 %v1449_v19, %s3367_s24  ;;  %v1273_v18 = vmul.f32 1.442695, %v1232_v15 }
 0x265   : > { %v3153_v23 = vpop.eup %3152  ;;  %v1285_v39 = vmul.f32 1.442695, %v1238_v20 }
 0x266   : > { %1379 = vrot.lane.b32.xlu1 %v3153_v23, %s3366_s16 }
 0x267   : > { %3154 = vpow2.f32 %v1285_v39 }
 0x268   : > { %v1183_v24 = vpop.f32.mrf.mxu2  ;;  %v1352_v48 = vpop.permute.xlu0 %1351 }
 0x269   : > { %v3829_v30 = vadd.f32 %v3748_v32, %v1183_v24  ;;  %v1447_v25 = vmul.f32 %v1352_v48, %v527_v47  ;;  %v1358_v52 = vpop.permute.xlu2 %1357  ;;  %v2859_v47 = vld [vmem:[#allocation7 + $0x8] sm:$0xff]  ;;  %v2858_v24 = vld [vmem:[#allocation7] sm:$0xff] }
 0x26a   : > { %v1450_v53 = vmul.f32 %v1358_v52, %v530_v45  ;;  %1730 = vmatpush.bf16.msrb.mxu2 %v2859_v47  ;;  %2976 = vmatpush.bf16.msra.mxu3 %v2859_v47 }
 0x26b   : > { %v1239_v26 = vmul.f32 0.5, %v3829_v30  ;;  %1511 = vrot.lane.b32.xlu0 %v1447_v25, %s3367_s24 }
 0x26d   : > { %v3155_v27 = vpop.eup %3154  ;;  %v1287_v28 = vmul.f32 1.442695, %v1239_v26 }
 0x26e   : > { %1381 = vrot.lane.b32.xlu1 %v3155_v27, %s3366_s16  ;;  %1731 = vmatpush.bf16.msrb.mxu2 %v2858_v24  ;;  %v509_v27 = vld [vmem:[%s3544_s8 + $0x38] sm:$0xff]  }
 0x26f   : > { %3156 = vpow2.f32 %v1287_v28  ;;  %2977 = vmatpush.bf16.msra.mxu3 %v2858_v24 }
 0x270   : > { %v1185_v31 = vpop.f32.mrf.mxu2  ;;  %v1354_v56 = vpop.permute.xlu0 %1353 }
 0x271   : > { %v3835_v51 = vadd.f32 %v3748_v32, %v1185_v31  ;;  %v1448_v40 = vmul.f32 %v1354_v56, %v528_v35  ;;  %v1360_v23 = vpop.permute.xlu2 %1359  ;;  %v541_v35 = vunpack.c.l.bf16 %v509_v27  ;;  %v3879_v56 = vadd.f32 %v3748_v32, %v3797_v41 }
 0x272   : > { %v1451_v39 = vmul.f32 %v1360_v23, %v531_v50 }
 0x273   : > { %v1240_v38 = vmul.f32 0.5, %v3835_v51  ;;  %v1231_v45 = vmul.f32 0.5, %v3879_v56 }
 0x275   : > { %v3157_v43 = vpop.eup %3156  ;;  %v1289_v44 = vmul.f32 1.442695, %v1240_v38 }
 0x276   : > { %1513 = vrot.lane.b32.xlu1 %v1448_v40, %s3367_s24  ;;  %1383 = vrot.lane.b32.xlu0 %v3157_v43, %s3366_s16 }
 0x277   : > { %3158 = vpow2.f32 %v1289_v44 }
 0x278   : > { %v1188_v49 = vpop.f32.mrf.mxu2 }
 0x279   : > { %v3841_v63 = vadd.f32 %v3748_v32, %v1188_v49  ;;  %v542_v49 = vunpack.c.h.bf16 %v509_v27 }
 0x27b   : > { %v1241_v3 = vmul.f32 0.5, %v3841_v63 }
 0x27d   : > { %v3159_v57 = vpop.eup %3158  ;;  %v1291_v59 = vmul.f32 1.442695, %v1241_v3  ;;  %v1271_v3 = vmul.f32 1.442695, %v1231_v45 }
 0x27e   : > { %1385 = vrot.lane.b32.xlu1 %v3159_v57, %s3366_s16  ;;  %1517 = vrot.lane.b32.xlu0 %v1450_v53, %s3367_s24 }
 0x27f   : > { %3160 = vpow2.f32 %v1291_v59 }
 0x280   : > { %v1190_v60 = vpop.f32.mrf.mxu2 }
 0x281   : > { %v3847_v62 = vadd.f32 %v3748_v32, %v1190_v60 }
 0x283   : > { %v1242_v0 = vmul.f32 0.5, %v3847_v62 }
 0x285   : > { %v3161_v1 = vpop.eup %3160  ;;  %v1293_v9 = vmul.f32 1.442695, %v1242_v0 }
 0x286   : > { %1387 = vrot.lane.b32.xlu1 %v3161_v1, %s3366_s16  ;;  %v511_v1 = vld [vmem:[%s3544_s8 + $0x40] sm:$0xff]  }
 0x287   : > { %3162 = vpow2.f32 %v1293_v9  ;;  %v544_v24 = vunpack.c.h.bf16 %v511_v1 }
 0x288   : > { %v1193_v4 = vpop.f32.mrf.mxu2 }
 0x289   : > { %v3852_v5 = vadd.f32 %v3748_v32, %v1193_v4  ;;  %v532_v4 = vunpack.c.h.bf16 %v499_v22 }
 0x28b   : > { %v1243_v6 = vmul.f32 0.5, %v3852_v5 }
 0x28d   : > { %v3163_v8 = vpop.eup %3162  ;;  %v1295_v11 = vmul.f32 1.442695, %v1243_v6 }
 0x28e   : > { %1389 = vrot.lane.b32.xlu2 %v3163_v8, %s3366_s16  ;;  %v543_v8 = vunpack.c.l.bf16 %v511_v1 }
 0x28f   : > { %3164 = vpow2.f32 %v1295_v11  ;;  %v3896_v11 = vadd.f32 %v3748_v32, %v3804_v55 }
 0x290   : > { %v1195_v29 = vpop.f32.mrf.mxu2  ;;  %v1362_v43 = vpop.permute.xlu0 %1361 }
 0x291   : > { %v3857_v36 = vadd.f32 %v3748_v32, %v1195_v29  ;;  %v3898_v29 = vpop.permute.xlu2 %1365  ;;  %v1452_v15 = vmul.f32 %v1362_v43, %v532_v4  ;;  %v1233_v55 = vmul.f32 0.5, %v3896_v11 }
 0x293   : > { %v1244_v12 = vmul.f32 0.5, %v3857_v36 }
 0x295   : > { %v3165_v13 = vpop.eup %3164  ;;  %v1297_v14 = vmul.f32 1.442695, %v1244_v12  ;;  %v3902_v12 = vadd.f32 %v3748_v32, %v3808_v61 }
 0x296   : > { %1391 = vrot.lane.b32.xlu0 %v3165_v13, %s3366_s16 }
 0x297   : > { %3166 = vpow2.f32 %v1297_v14  ;;  %v1234_v61 = vmul.f32 0.5, %v3902_v12 }
 0x298   : > { %3168 = vpow2.f32 %v1273_v18  ;;  %v1198_v48 = vpop.f32.mrf.mxu2  ;;  %v3873_v26 = vpop.permute.xlu1 %1363 }
 0x299   : > { %v3871_v25 = vadd.f32 %v3748_v32, %v1198_v48  ;;  %v1275_v48 = vmul.f32 1.442695, %v1233_v55 }
 0x29b   : > { %v1245_v28 = vmul.f32 0.5, %v3871_v25 }
 0x29d   : > { %v3167_v19 = vpop.eup %3166  ;;  %v1299_v38 = vmul.f32 1.442695, %v1245_v28  ;;  %v1277_v28 = vmul.f32 1.442695, %v1234_v61 }
 0x29e   : > { %1393 = vrot.lane.b32.xlu1 %v3167_v19, %s3366_s16  ;;  %v3169_v20 = vpop.eup %3168 }
 0x29f   : > { %3170 = vpow2.f32 %v1299_v38 }
 0x2a0   : > { %v1200_v31 = vpop.f32.mrf.mxu2  ;;  %3172 = vpow2.f32 %v1271_v3 }
 0x2a1   : > { %v3884_v53 = vadd.f32 %v3748_v32, %v1200_v31 }
 0x2a3   : > { %v1246_v9 = vmul.f32 0.5, %v3884_v53 }
 0x2a5   : > { %v3171_v0 = vpop.eup %3170  ;;  %v1301_v13 = vmul.f32 1.442695, %v1246_v9  ;;  %v3930_v9 = vadd.f32 %v3748_v32, %v3810_v2 }
 0x2a6   : > { %1369 = vrot.lane.b32.xlu1 %v3169_v20, %s3366_s16  ;;  %v3173_v50 = vpop.eup %3172 }
 0x2a7   : > { %3174 = vpow2.f32 %v1301_v13  ;;  %v513_v13 = vld [vmem:[%s3544_s8 + $0x48] sm:$0xf]  ;;  %v1235_v2 = vmul.f32 0.5, %v3930_v9 }
 0x2a8   : > { %v1203_v52 = vpop.f32.mrf.mxu2 }
 0x2a9   : > { %v3887_v41 = vadd.f32 %v3748_v32, %v1203_v52 }
 0x2ab   : > { %v1247_v6 = vmul.f32 0.5, %v3887_v41 }
 0x2ad   : > { %v1303_v18 = vmul.f32 1.442695, %v1247_v6 }
 0x2ae   : > { %1519 = vrot.lane.b32.xlu1 %v1451_v39, %s3367_s24 }
 0x2af   : > { %3176 = vpow2.f32 %v1303_v18  ;;  %v545_v18 = vunpack.c.l.bf16 %v513_v13 }
 0x2b0   : > { %v1205_v23 = vpop.f32.mrf.mxu2  ;;  %3178 = vpow2.f32 %v1275_v48 }
 0x2b1   : > { %v3913_v31 = vadd.f32 %v3748_v32, %v1205_v23  ;;  %3180 = vpow2.f32 %v1277_v28  ;;  %v1279_v23 = vmul.f32 1.442695, %v1235_v2 }
 0x2b3   : > { %v1248_v45 = vmul.f32 0.5, %v3913_v31 }
 0x2bd   : > { %v1516_v27 = vpop.permute.xlu2 %1515 }
 0x2be   : > { %v1609_v4 = vadd.f32 %v1516_v27, %v3762_v54 }
 0x2d8   : > { %v1380_v40 = vpop.permute.xlu1 %1379 }
 0x2d9   : > { %v1461_v44 = vmul.f32 %v1380_v40, %v541_v35  ;;  %v3175_v40 = vpop.eup %3174 }
 0x2da   : > { %v3177_v43 = vpop.eup %3176 }
 0x2db   : > { %1539 = vrot.lane.b32.xlu2 %v1461_v44, %s3367_s24  ;;  %v3916_v44 = vld [vmem:[%s3544_s8 + $0x4c] sm:$0xff]   ;;  %v3179_v1 = vpop.eup %3178 }
 0x2dc   : > { %v546_v3 = vunpack.c.l.bf16 %v3916_v44  ;;  %v3181_v6 = vpop.eup %3180 }
 0x2dd   : > { %v1512_v59 = vpop.permute.xlu0 %1511 }
 0x2de   : > { %v1607_v19 = vadd.f32 %v1512_v59, %v3751_v37 }
 0x2e0   : > { %v1382_v57 = vpop.permute.xlu1 %1381 }
 0x2e1   : > { %v1462_v60 = vmul.f32 %v1382_v57, %v542_v49  ;;  %v1208_v49 = vpop.f32.mrf.mxu2 }
 0x2e2   : > { %v3954_v28 = vadd.f32 %v3748_v32, %v1208_v49 }
 0x2e3   : > { %1395 = vrot.lane.b32.xlu2 %v3171_v0, %s3366_s16  ;;  %1541 = vrot.lane.b32.xlu0 %v1462_v60, %s3367_s24  ;;  %v3926_v60 = vadd.f32 %v3748_v32, %v3814_v7  ;;  %v1305_v0 = vmul.f32 1.442695, %v1248_v45 }
 0x2e4   : > { %v1249_v45 = vmul.f32 0.5, %v3954_v28 }
 0x2e5   : > { %v1236_v7 = vmul.f32 0.5, %v3926_v60  ;;  %3182 = vpow2.f32 %v1305_v0 }
 0x2e8   : > { %v1514_v14 = vpop.permute.xlu1 %1513  ;;  %v1384_v22 = vpop.permute.xlu0 %1383 }
 0x2e9   : > { %v1608_v20 = vadd.f32 %v1514_v14, %v3757_v46  ;;  %v1463_v39 = vmul.f32 %v1384_v22, %v543_v8  ;;  %v1390_v57 = vpop.permute.xlu2 %1389  ;;  %v3935_v14 = vld [vmem:[%s3544_s8 + $0x1c] sm:$0xff]  }
 0x2ea   : > { %v1466_v8 = vmul.f32 %v1390_v57, %v546_v3  ;;  %v1307_v57 = vmul.f32 1.442695, %v1249_v45 }
 0x2eb   : > { %v1639_v47 = vpack.c.bf16 %v1608_v20, %v1607_v19  ;;  %1521 = vrot.lane.b32.xlu2 %v1452_v15, %s3367_s24  ;;  %1367 = vrot.lane.b32.xlu0 %v3173_v50, %s3366_s16  ;;  %v534_v19 = vunpack.c.l.bf16 %v3935_v14  ;;  %v1210_v20 = vpop.f32.mrf.mxu2  ;;  %v1281_v50 = vmul.f32 1.442695, %v1236_v7 }
 0x2ec   : > { %1543 = vrot.lane.b32.xlu1 %v1463_v39, %s3367_s24  ;;  %v3945_v39 = vadd.f32 %v3748_v32, %v1210_v20 }
 0x2ed   : > { %2736 = vmatmul.msk.bf16.vlgmr.msrb.gmra.mxu2 %vm1675_vm1, %v1639_v47  ;;  %v3183_v47 = vpop.eup %3182  ;;  %v1454_v61 = vmul.f32 %v3898_v29, %v534_v19  ;;  %3184 = vpow2.f32 %v1281_v50  ;;  %v516_v29 = vld [vmem:[%s3544_s8 + $0x54] sm:$0xff]  }
 0x2ee   : > { %3186 = vpow2.f32 %v1279_v23  ;;  %v1250_v27 = vmul.f32 0.5, %v3945_v39  ;;  %v548_v49 = vunpack.c.l.bf16 %v516_v29 }
 0x2f0   : > { %v1386_v35 = vpop.permute.xlu1 %1385  ;;  %v1518_v52 = vpop.permute.xlu0 %1517 }
 0x2f1   : > { %v1464_v38 = vmul.f32 %v1386_v35, %v544_v24  ;;  %v1610_v59 = vadd.f32 %v1518_v52, %v3769_v16  ;;  %v501_v24 = vld [vmem:[%s3544_s8 + $0x18] sm:$0xf]  ;;  %v547_v52 = vunpack.c.h.bf16 %v3916_v44  ;;  %v3970_v44 = vld [vmem:[%s3544_s8 + $0x24] sm:$0xff]  }
 0x2f2   : > { %v533_v48 = vunpack.c.l.bf16 %v501_v24 }
 0x2f3   : > { %1545 = vrot.lane.b32.xlu2 %v1464_v38, %s3367_s24  ;;  %1397 = vrot.lane.b32.xlu0 %v3175_v40, %s3366_s16  ;;  %v1640_v15 = vpack.c.bf16 %v1610_v59, %v1609_v4  ;;  %v1309_v38 = vmul.f32 1.442695, %v1250_v27  ;;  %v3185_v40 = vpop.eup %3184  ;;  %v1213_v4 = vpop.f32.mrf.mxu2 }
 0x2f4   : > { %1399 = vrot.lane.b32.xlu1 %v3177_v43, %s3366_s16  ;;  %v1453_v35 = vmul.f32 %v3873_v26, %v533_v48  ;;  %v3187_v43 = vpop.eup %3186 }
 0x2f5   : > { %3188 = vpow2.f32 %v1309_v38 }
 0x2f6   : > { %3190 = vpow2.f32 %v1307_v57  ;;  %v535_v57 = vunpack.c.h.bf16 %v3935_v14 }
 0x2f8   : > { %v1388_v22 = vpop.permute.xlu1 %1387 }
 0x2f9   : > { %v1465_v55 = vmul.f32 %v1388_v22, %v545_v18 }
 0x2fb   : > { %1371 = vrot.lane.b32.xlu2 %v3179_v1, %s3366_s16  ;;  %1373 = vrot.lane.b32.xlu0 %v3181_v6, %s3366_s16  ;;  %v3189_v1 = vpop.eup %3188  ;;  %v3967_v6 = vadd.f32 %v3748_v32, %v1213_v4  ;;  %v1215_v20 = vpop.f32.mrf.mxu2 }
 0x2fc   : > { %1549 = vrot.lane.b32.xlu1 %v1466_v8, %s3367_s24  ;;  %v3191_v8 = vpop.eup %3190  ;;  %v3978_v22 = vadd.f32 %v3748_v32, %v1215_v20 }
 0x2fd   : > { %2737 = vmatmul.msk.bf16.gmra.mxu2 %vm1675_vm1, %v1640_v15  ;;  %v1251_v13 = vmul.f32 0.5, %v3967_v6  ;;  %v536_v15 = vunpack.c.l.bf16 %v3970_v44 }
 0x2fe   : > { %v1252_v23 = vmul.f32 0.5, %v3978_v22 }
 0x2ff   : > { %v1311_v2 = vmul.f32 1.442695, %v1251_v13  ;;  %v519_v13 = vld [vmem:[%s3544_s8 + $0x5c] sm:$0xff]  }
 0x301   : > { %3192 = vpow2.f32 %v1311_v2  ;;  %v551_v2 = vunpack.c.h.bf16 %v519_v13 }
 0x303   : > { %1401 = vrot.lane.b32.xlu2 %v3183_v47, %s3366_s16  ;;  %1547 = vrot.lane.b32.xlu0 %v1465_v55, %s3367_s24  ;;  %v549_v55 = vunpack.c.h.bf16 %v516_v29  ;;  %v1313_v47 = vmul.f32 1.442695, %v1252_v23  ;;  %v1218_v29 = vpop.f32.mrf.mxu2 }
 0x304   : > { %1525 = vrot.lane.b32.xlu1 %v1454_v61, %s3367_s24  ;;  %v3998_v14 = vadd.f32 %v3748_v32, %v1218_v29 }
 0x305   : > { %3194 = vpow2.f32 %v1313_v47 }
 0x307   : > { %v3193_v19 = vpop.eup %3192 }
 0x308   : > { %v1392_v3 = vpop.permute.xlu0 %1391 }
 0x309   : > { %v1467_v59 = vmul.f32 %v1392_v3, %v547_v52 }
 0x30b   : > { %1377 = vrot.lane.b32.xlu2 %v3185_v40, %s3366_s16  ;;  %1523 = vrot.lane.b32.xlu0 %v1453_v35, %s3367_s24  ;;  %v3195_v40 = vpop.eup %3194 }
 0x30c   : > { %1375 = vrot.lane.b32.xlu1 %v3187_v43, %s3366_s16 }
 0x310   : > { %v1394_v26 = vpop.permute.xlu1 %1393 }
 0x311   : > { %v1468_v0 = vmul.f32 %v1394_v26, %v548_v49  ;;  %v1220_v26 = vpop.f32.mrf.mxu2 }
 0x313   : > { %1553 = vrot.lane.b32.xlu0 %v1468_v0, %s3367_s24  ;;  %1551 = vrot.lane.b32.xlu2 %v1467_v59, %s3367_s24 }
 0x314   : > { %1405 = vrot.lane.b32.xlu1 %v3189_v1, %s3366_s16  ;;  %v3991_v1 = vadd.f32 %v3748_v32, %v1220_v26  ;;  %v537_v32 = vunpack.c.h.bf16 %v3970_v44 }
 0x318   : > { %v1370_v7 = vpop.permute.xlu1 %1369 }
 0x319   : > { %v1456_v18 = vmul.f32 %v1370_v7, %v536_v15  ;;  %v1254_v15 = vmul.f32 0.5, %v3991_v1  ;;  %v550_v7 = vunpack.c.l.bf16 %v519_v13  ;;  %v508_v13 = vld [vmem:[%s3544_s8 + $0x34] sm:$0xf] }
 0x31b   : > { %1403 = vrot.lane.b32.xlu0 %v3191_v8, %s3366_s16 }
 0x320   : > { %v1520_v48 = vpop.permute.xlu1 %1519 }
 0x321   : > { %v1611_v35 = vadd.f32 %v1520_v48, %v3774_v10 }
 0x323   : > { %1529 = vrot.lane.b32.xlu0 %v1456_v18, %s3367_s24 }
 0x32b   : > { %1407 = vrot.lane.b32.xlu0 %v3193_v19, %s3366_s16 }
 0x335   : > { %v1540_v50 = vpop.permute.xlu2 %1539 }
 0x336   : > { %v1621_v52 = vadd.f32 %v1540_v50, %v3817_v21  ;;  %v1317_v50 = vmul.f32 1.442695, %v1254_v15 }
 0x338   : > { %3196 = vpow2.f32 %v1317_v50 }
 0x33d   : > { %v1396_v61 = vpop.permute.xlu2 %1395 }
 0x33e   : > { %v1469_v24 = vmul.f32 %v1396_v61, %v549_v55 }
 0x340   : > { %1555 = vrot.lane.b32.xlu1 %v1469_v24, %s3367_s24  ;;  %v506_v24 = vld [vmem:[%s3544_s8 + $0x2c] sm:$0xff]  }
 0x345   : > { %v1522_v27 = vpop.permute.xlu2 %1521 }
 0x346   : > { %v1612_v38 = vadd.f32 %v1522_v27, %v3781_v17  ;;  %v1253_v27 = vmul.f32 0.5, %v3998_v14 }
 0x348   : > { %v1641_v43 = vpack.c.bf16 %v1612_v38, %v1611_v35  ;;  %1409 = vrot.lane.b32.xlu1 %v3195_v40, %s3366_s16  ;;  %v538_v35 = vunpack.c.l.bf16 %v506_v24  ;;  %v1315_v38 = vmul.f32 1.442695, %v1253_v27 }
 0x34a   : > { %2738 = vmatmul.msk.bf16.gmra.mxu2 %vm1675_vm1, %v1641_v43  ;;  %3198 = vpow2.f32 %v1315_v38 }
 0x34d   : > { %v1546_v59 = vpop.permute.xlu2 %1545 }
 0x34e   : > { %v1624_v23 = vadd.f32 %v1546_v59, %v3835_v51 }
 0x355   : > { %v1542_v45 = vpop.permute.xlu0 %1541  ;;  %v1372_v19 = vpop.permute.xlu2 %1371 }
 0x356   : > { %v1622_v49 = vadd.f32 %v1542_v45, %v3822_v58  ;;  %v1457_v43 = vmul.f32 %v1372_v19, %v537_v32 }
 0x358   : > { %v1646_v3 = vpack.c.bf16 %v1622_v49, %v1621_v52  ;;  %v520_v52 = vld [vmem:[%s3544_s8 + $0x64] sm:$0xff]  }
 0x359   : > { %v552_v44 = vunpack.c.l.bf16 %v520_v52 }
 0x35a   : > { %2743 = vmatmul.msk.bf16.vlgmr.msra.gmra.mxu3 %vm1675_vm1, %v1646_v3  ;;  %v3197_v3 = vpop.eup %3196 }
 0x35d   : > { %v1368_v0 = vpop.permute.xlu0 %1367  ;;  %v1402_v49 = vpop.permute.xlu2 %1401 }
 0x35e   : > { %v1544_v4 = vpop.permute.xlu1 %1543  ;;  %v1455_v8 = vmul.f32 %v1368_v0, %v535_v57  ;;  %v1472_v26 = vmul.f32 %v1402_v49, %v552_v44 }
 0x35f   : > { %v1623_v18 = vadd.f32 %v1544_v4, %v3829_v30 }
 0x360   : > { %1527 = vrot.lane.b32.xlu2 %v1455_v8, %s3367_s24  ;;  %v3199_v8 = vpop.eup %3198 }
 0x361   : > { %v1647_v48 = vpack.c.bf16 %v1624_v23, %v1623_v18  ;;  %v539_v18 = vunpack.c.h.bf16 %v506_v24 }
 0x365   : > { %v1398_v20 = vpop.permute.xlu0 %1397 }
 0x366   : > { %v1400_v55 = vpop.permute.xlu1 %1399  ;;  %v1470_v47 = vmul.f32 %v1398_v20, %v550_v7  ;;  %v1378_v7 = vpop.permute.xlu2 %1377 }
 0x367   : > { %v1471_v61 = vmul.f32 %v1400_v55, %v551_v2  ;;  %v540_v2 = vunpack.c.l.bf16 %v508_v13 }
 0x368   : > { %1557 = vrot.lane.b32.xlu2 %v1470_v47, %s3367_s24 }
 0x369   : > { %1559 = vrot.lane.b32.xlu1 %v1471_v61, %s3367_s24  ;;  %v1460_v20 = vmul.f32 %v1378_v7, %v540_v2 }
 0x36a   : > { %2744 = vmatmul.msk.bf16.gmra.mxu3 %vm1675_vm1, %v1647_v48  ;;  %v522_v48 = vld [vmem:[%s3544_s8 + $0x6c] sm:$0xff]  }
 0x36b   : > { %v554_v32 = vunpack.c.l.bf16 %v522_v48 }
 0x36d   : > { %v1374_v40 = vpop.permute.xlu0 %1373 }
 0x36e   : > { %v1550_v29 = vpop.permute.xlu1 %1549  ;;  %v1458_v45 = vmul.f32 %v1374_v40, %v538_v35  ;;  %v1552_v27 = vpop.permute.xlu2 %1551 }
 0x36f   : > { %v1626_v59 = vadd.f32 %v1550_v29, %v3847_v62  ;;  %v1627_v24 = vadd.f32 %v1552_v27, %v3852_v5  ;;  %v2866_v27 = vld [vmem:[%s4412_s9 + $0x30] sm:$0xff] }
 0x370   : > { %1531 = vrot.lane.b32.xlu2 %v1457_v43, %s3367_s24  ;;  %1533 = vrot.lane.b32.xlu0 %v1458_v45, %s3367_s24  ;;  %v553_v45 = vunpack.c.h.bf16 %v520_v52 }
 0x371   : > { %1413 = vrot.lane.b32.xlu1 %v3197_v3, %s3366_s16 }
 0x375   : > { %v1548_v57 = vpop.permute.xlu0 %1547 }
 0x376   : > { %v1526_v0 = vpop.permute.xlu1 %1525  ;;  %v1625_v4 = vadd.f32 %v1548_v57, %v3841_v63  ;;  %v555_v57 = vunpack.c.h.bf16 %v522_v48 }
 0x377   : > { %v1614_v50 = vadd.f32 %v1526_v0, %v3793_v34 }
 0x378   : > { %v1648_v15 = vpack.c.bf16 %v1626_v59, %v1625_v4  ;;  %1561 = vrot.lane.b32.xlu2 %v1472_v26, %s3367_s24  ;;  %1411 = vrot.lane.b32.xlu0 %v3199_v8, %s3366_s16  ;;  %v524_v4 = vld [vmem:[%s3544_s8 + $0x74] sm:$0xff]   ;;  %s3306_s16 = scalar_lea.hbm %s3305_s18, 128 }
 0x379   : > { %v556_v8 = vunpack.c.l.bf16 %v524_v4  ;;  %p3307_p4 = scmp.ne.s32.totalorder %s3305_s18, %s3306_s16  ;;  %p3312_p5 = scmp.lt.s32.totalorder %s3310_s10, %s3306_s16 }
 0x37a   : > { %2745 = vmatmul.msk.bf16.gmra.mxu3 %vm1675_vm1, %v1648_v15 }
 0x37b   : > { %p3308_p6 = pnand %p3307_p4, %p3491_p11  ;;  %p3313_p7 = por %p3312_p5, %p3311_p3 }
 0x37d   : > { %v1524_v19 = vpop.permute.xlu0 %1523  ;;  %p3309_p13 = pneg %p3308_p6 }
 0x37e   : > { %v1376_v23 = vpop.permute.xlu1 %1375  ;;  %v1613_v55 = vadd.f32 %v1524_v19, %v3786_v42  ;;  %v2867_v19 = vld [vmem:[%s4412_s9 + $0x38] sm:$0xff] }
 0x37f   : > { %v1459_v47 = vmul.f32 %v1376_v23, %v539_v18  ;;  %1929 = vmatpush.bf16.msrb.mxu3 %v2867_v19  ;;  %p3314_p8 = pnand %p3313_p7, %p3309_p13 }
 0x380   : > { %v1642_v61 = vpack.c.bf16 %v1614_v50, %v1613_v55  ;;  %1537 = vrot.lane.b32.xlu0 %v1460_v20, %s3367_s24  ;;  %v3050_v55 = vpack.i.bf16 %v3757_v46, %v3751_v37  ;;  %v3080_v37 = vpack.i.bf16 %v3926_v60, %v3930_v9 }
 0x381   : > { %1535 = vrot.lane.b32.xlu2 %v1459_v47, %s3367_s24 }
 0x382   : > { %2739 = vmatmul.msk.bf16.gmra.mxu2 %vm1675_vm1, %v1642_v61  ;;  %v3065_v61 = vpack.i.bf16 %v3793_v34, %v3786_v42 }
 0x383   : > { %1930 = vmatpush.bf16.msrb.mxu3 %v2866_v27 }
 0x385   : > { %v1554_v35 = vpop.permute.xlu0 %1553 }
 0x386   : > { %v1406_v38 = vpop.permute.xlu1 %1405  ;;  %v1628_v40 = vadd.f32 %v1554_v35, %v3857_v36  ;;  %v3095_v35 = vpack.i.bf16 %v3847_v62, %v3841_v63 }
 0x387   : > { %v1474_v43 = vmul.f32 %v1406_v38, %v554_v32 }
 0x388   : > { %v1649_v29 = vpack.c.bf16 %v1628_v40, %v1627_v24  ;;  %v526_v24 = vld [vmem:[%s3544_s8 + $0x7c] sm:$0xf]  ;;  %s4447_s8 = sld [smem:[#allocation22_spill]] }
 0x389   : > { %1565 = vrot.lane.b32.xlu2 %v1474_v43, %s3367_s24  ;;  %v558_v40 = vunpack.c.l.bf16 %v526_v24  ;;  %v2865_v43 = vld [vmem:[%s4412_s9 + $0x28] sm:$0xff] }
 0x38a   : > { %2746 = vmatmul.msk.bf16.gmra.mxu3 %vm1675_vm1, %v1649_v29 }
 0x38b   : > { %1931 = vmatpush.bf16.msrb.mxu3 %v2865_v43 }
 0x38d   : > { %v1404_v49 = vpop.permute.xlu0 %1403 }
 0x38e   : > { %v1473_v3 = vmul.f32 %v1404_v49, %v553_v45  ;;  %v3110_v49 = vpack.i.bf16 %v3913_v31, %v3887_v41 }
 0x390   : > { %1563 = vrot.lane.b32.xlu1 %v1473_v3, %s3367_s24 }
 0x395   : > { %v1530_v44 = vpop.permute.xlu0 %1529 }
 0x396   : > { %v1616_v7 = vadd.f32 %v1530_v44, %v3861_v33 }
 0x39d   : > { %v1408_v26 = vpop.permute.xlu0 %1407 }
 0x39e   : > { %v1475_v59 = vmul.f32 %v1408_v26, %v555_v57  ;;  %v557_v57 = vunpack.c.h.bf16 %v524_v4  ;;  %v2864_v4 = vld [vmem:[%s4412_s9 + $0x20] sm:$0xff] }
 0x39f   : > { %1932 = vmatpush.bf16.msrb.mxu3 %v2864_v4 }
 0x3a0   : > { %1567 = vrot.lane.b32.xlu0 %v1475_v59, %s3367_s24 }
 0x3b2   : > { %v1556_v0 = vpop.permute.xlu1 %1555 }
 0x3b3   : > { %v1629_v50 = vadd.f32 %v1556_v0, %v3871_v25  ;;  %v3125_v0 = vpack.i.bf16 %v3991_v1, %v3998_v14 }
 0x3ba   : > { %v1410_v13 = vpop.permute.xlu1 %1409  ;;  %v1528_v15 = vpop.permute.xlu2 %1527 }
 0x3bb   : > { %v1476_v2 = vmul.f32 %v1410_v13, %v556_v8  ;;  %v1615_v52 = vadd.f32 %v1528_v15, %v3879_v56  ;;  %v3060_v8 = vpack.i.bf16 %v3781_v17, %v3774_v10  ;;  %v3075_v10 = vpack.i.bf16 %v3902_v12, %v3896_v11 }
 0x3bd   : > { %v1643_v18 = vpack.c.bf16 %v1616_v7, %v1615_v52  ;;  %1569 = vrot.lane.b32.xlu1 %v1476_v2, %s3367_s24  ;;  %v3055_v7 = vpack.i.bf16 %v3769_v16, %v3762_v54  ;;  %v3090_v54 = vpack.i.bf16 %v3835_v51, %v3829_v30  ;;  %v3085_v52 = vpack.i.bf16 %v3822_v58, %v3817_v21  ;;  %v2862_v58 = vld [vmem:[%s4412_s9 + $0x10] sm:$0xff] }
 0x3be   : > { %v3100_v30 = vpack.i.bf16 %v3857_v36, %v3852_v5  ;;  %v3120_v51 = vpack.i.bf16 %v3978_v22, %v3967_v6  ;;  %v3115_v21 = vpack.i.bf16 %v3945_v39, %v3954_v28  ;;  %v2861_v5 = vld [vmem:[%s4412_s9 + $0x8] sm:$0xff] }
 0x3bf   : > { %2740 = vmatmul.msk.bf16.gmra.mxu2 %vm1675_vm1, %v1643_v18  ;;  %v3105_v18 = vpack.i.bf16 %v3884_v53, %v3871_v25 }
 0x3c2   : > { %v1558_v20 = vpop.permute.xlu2 %1557 }
 0x3c3   : > { %v1630_v23 = vadd.f32 %v1558_v20, %v3884_v53 }
 0x3c5   : > { %v1650_v47 = vpack.c.bf16 %v1630_v23, %v1629_v50  ;;  %3051 = vrot.lane.b32.xlu1 %v3050_v55, %s3367_s24  ;;  %v2875_v50 = vld [vmem:[%s4414_s11 + $0x38] sm:$0xff] }
 0x3c6   : > { %2134 = vmatpush.bf16.msrb.mxu0 %v2875_v50 }
 0x3c7   : > { %2747 = vmatmul.msk.bf16.gmra.mxu3 %vm1675_vm1, %v1650_v47 }
 0x3ca   : > { %v1532_v48 = vpop.permute.xlu2 %1531 }
 0x3cb   : > { %v1617_v45 = vadd.f32 %v1532_v48, %v3896_v11 }
 0x3cd   : > { %3066 = vrot.lane.b32.xlu1 %v3065_v61, %s3367_s24 }
 0x3d2   : > { %v1562_v46 = vpop.permute.xlu2 %1561 }
 0x3d3   : > { %v1632_v42 = vadd.f32 %v1562_v46, %v3913_v31  ;;  %v4142_v46 = vld [vmem:[%s4445_s12] ss:$0 sm:$0xff]  ;;  %s4446_s12 = sld [smem:[#allocation21_spill]] }
 0x3d5   : > { %3081 = vrot.lane.b32.xlu1 %v3080_v37, %s3367_s24 }
 0x3db   : > { %v1560_v32 = vpop.permute.xlu1 %1559 }
 0x3dc   : > { %v1631_v34 = vadd.f32 %v1560_v32, %v3887_v41  ;;  %v1536_v41 = vpop.permute.xlu2 %1535  ;;  %v2874_v32 = vld [vmem:[%s4414_s11 + $0x30] sm:$0xff] }
 0x3dd   : > { %3096 = vrot.lane.b32.xlu1 %v3095_v35, %s3367_s24  ;;  %v1619_v13 = vadd.f32 %v1536_v41, %v3930_v9  ;;  %v2863_v9 = vld [vmem:[%s4412_s9 + $0x18] sm:$0xff]  ;;  %v4127_v20 = vpop.f32.mrf.mxu3  ;;  %2135 = vmatpush.bf16.msrb.mxu0 %v2874_v32 }
 0x3de   : > { %v1651_v38 = vpack.c.bf16 %v1632_v42, %v1631_v34  ;;  %1933 = vmatpush.bf16.msrb.mxu3 %v2863_v9 }
 0x3e0   : > { %2748 = vmatmul.msk.bf16.gmra.mxu3 %vm1675_vm1, %v1651_v38 }
 0x3e2   : > { %v1534_v29 = vpop.permute.xlu0 %1533  ;;  %1934 = vmatpush.bf16.msrb.mxu3 %v2862_v58 }
 0x3e3   : > { %v1414_v63 = vpop.permute.xlu1 %1413  ;;  %v1618_v62 = vadd.f32 %v1534_v29, %v3902_v12 }
 0x3e4   : > { %v1478_v3 = vmul.f32 %v1414_v63, %v558_v40  ;;  %v1566_v16 = vpop.permute.xlu2 %1565  ;;  %v2873_v63 = vld [vmem:[%s4414_s11 + $0x28] sm:$0xff] }
 0x3e5   : > { %v1644_v44 = vpack.c.bf16 %v1618_v62, %v1617_v45  ;;  %3111 = vrot.lane.b32.xlu1 %v3110_v49, %s3367_s24  ;;  %v1634_v12 = vadd.f32 %v1566_v16, %v3945_v39  ;;  %v2860_v39 = vld [vmem:[%s4412_s9] sm:$0xff]  ;;  %2136 = vmatpush.bf16.msrb.mxu0 %v2873_v63 }
 0x3e6   : > { %1573 = vrot.lane.b32.xlu0 %v1478_v3, %s3367_s24  ;;  %1935 = vmatpush.bf16.msrb.mxu3 %v2861_v5 }
 0x3e7   : > { %2741 = vmatmul.msk.bf16.gmra.mxu2 %vm1675_vm1, %v1644_v44 }
 0x3ea   : > { %v1412_v26 = vpop.permute.xlu0 %1411  ;;  %1936 = vmatpush.bf16.msrb.mxu3 %v2860_v39 }
 0x3eb   : > { %v1477_v59 = vmul.f32 %v1412_v26, %v557_v57  ;;  %v2872_v26 = vld [vmem:[%s4414_s11 + $0x20] sm:$0xff] }
 0x3ec   : > { %2137 = vmatpush.bf16.msrb.mxu0 %v2872_v26 }
 0x3ed   : > { %3126 = vrot.lane.b32.xlu1 %v3125_v0, %s3367_s24  ;;  %1571 = vrot.lane.b32.xlu2 %v1477_v59, %s3367_s24 }
 0x3ee   : > { %3061 = vrot.lane.b32.xlu0 %v3060_v8, %s3367_s24 }
 0x3f2   : > { %v1538_v31 = vpop.permute.xlu0 %1537 }
 0x3f3   : > { %v1620_v15 = vadd.f32 %v1538_v31, %v3926_v60  ;;  %v3070_v60 = vpack.i.bf16 %v3861_v33, %v3879_v56 }
 0x3f5   : > { %v1645_v17 = vpack.c.bf16 %v1620_v15, %v1619_v13  ;;  %3056 = vrot.lane.b32.xlu2 %v3055_v7, %s3367_s24  ;;  %v2871_v7 = vld [vmem:[%s4414_s11 + $0x18] sm:$0xff] }
 0x3f6   : > { %3076 = vrot.lane.b32.xlu0 %v3075_v10, %s3367_s24  ;;  %2138 = vmatpush.bf16.msrb.mxu0 %v2871_v7 }
 0x3f7   : > { %2742 = vmatmul.msk.bf16.gmra.mxu2 %vm1675_vm1, %v1645_v17 }
 0x3fd   : > { %3071 = vrot.lane.b32.xlu2 %v3070_v60, %s3367_s24 }
 0x3fe   : > { %3091 = vrot.lane.b32.xlu0 %v3090_v54, %s3367_s24 }
 0x402   : > { %v1564_v11 = vpop.permute.xlu1 %1563 }
 0x403   : > { %v1633_v2 = vadd.f32 %v1564_v11, %v3954_v28  ;;  %v1733_v28 = vpop.f32.mrf.mxu2 }
 0x405   : > { %v1652_v33 = vpack.c.bf16 %v1634_v12, %v1633_v2  ;;  %3086 = vrot.lane.b32.xlu2 %v3085_v52, %s3367_s24 }
 0x406   : > { %3106 = vrot.lane.b32.xlu0 %v3105_v18, %s3367_s24 }
 0x407   : > { %2749 = vmatmul.msk.bf16.gmra.mxu3 %vm1675_vm1, %v1652_v33  ;;  %v2870_v33 = vld [vmem:[%s4414_s11 + $0x10] sm:$0xff] }
 0x408   : > { %2139 = vmatpush.bf16.msrb.mxu0 %v2870_v33 }
 0x40b   : > { %v1735_v23 = vpop.f32.mrf.mxu2 }
 0x40c   : > { %v1736_v35 = vadd.f32 %v4142_v46, %v1735_v23 }
 0x40d   : > { %3101 = vrot.lane.b32.xlu2 %v3100_v30, %s3367_s24 }
 0x40e   : > { %3121 = vrot.lane.b32.xlu0 %v3120_v51, %s3367_s24  ;;  %v1814_v42 = vmax.f32 %v1736_v35, 0.0 }
 0x412   : > { %v1568_v36 = vpop.permute.xlu0 %1567 }
 0x413   : > { %v1635_v56 = vadd.f32 %v1568_v36, %v3967_v6  ;;  %v4132_v6 = vpop.f32.mrf.mxu3  ;;  %v1738_v48 = vpop.f32.mrf.mxu2 }
 0x414   : > { %v1739_v45 = vadd.f32 %v4142_v46, %v1738_v48 }
 0x415   : > { %3116 = vrot.lane.b32.xlu2 %v3115_v21, %s3367_s24 }
 0x416   : > { %v1815_v3 = vmax.f32 %v1739_v45, 0.0 }
 0x41b   : > { %v4137_v37 = vpop.f32.mrf.mxu3 }
 0x423   : > { %v4149_v34 = vpop.f32.mrf.mxu3 }
 0x42b   : > { %v4151_v43 = vpop.f32.mrf.mxu3 }
 0x42f   : > { %v1570_v25 = vpop.permute.xlu1 %1569 }
 0x430   : > { %v1636_v53 = vadd.f32 %v1570_v25, %v3978_v22 }
 0x432   : > { %v1653_v19 = vpack.c.bf16 %v1636_v53, %v1635_v56  ;;  %v2869_v56 = vld [vmem:[%s4414_s11 + $0x8] sm:$0xff] }
 0x433   : > { %v4158_v57 = vpop.f32.mrf.mxu3  ;;  %2140 = vmatpush.bf16.msrb.mxu0 %v2869_v56 }
 0x434   : > { %2750 = vmatmul.msk.bf16.gmra.mxu3 %vm1675_vm1, %v1653_v19 }
 0x43b   : > { %v4165_v41 = vpop.f32.mrf.mxu3 }
 0x443   : > { %v4170_v10 = vpop.f32.mrf.mxu3 }
 0x444   : > { %v1786_v33 = vadd.f32 %v4142_v46, %v4170_v10 }
 0x447   : > { %v1572_v22 = vpop.permute.xlu2 %1571 }
 0x448   : > { %v1637_v47 = vadd.f32 %v1572_v22, %v3998_v14  ;;  %v1740_v14 = vpop.f32.mrf.mxu2 }
 0x449   : > { %v1741_v29 = vadd.f32 %v4142_v46, %v1740_v14 }
 0x44b   : > { %v1816_v49 = vmax.f32 %v1741_v29, 0.0  ;;  %v4174_v16 = vpop.f32.mrf.mxu3 }
 0x44d   : > { %v1846_v44 = vpack.c.bf16 %v1816_v49, %v1815_v3  ;;  %v1776_v49 = vadd.f32 %v4142_v46, %v4149_v34  ;;  %v1774_v3 = vadd.f32 %v4142_v46, %v4137_v37  ;;  %v1781_v34 = vadd.f32 %v4142_v46, %v4158_v57  ;;  %v4222_v37 = vld [vmem:[%s4446_s12] ss:$0 sm:$0xff] }
 0x44f   : > { %v1832_v7 = vmax.f32 %v1781_v34, 0.0 }
 0x450   : > { %v1743_v40 = vpop.f32.mrf.mxu2 }
 0x451   : > { %v1744_v8 = vadd.f32 %v4142_v46, %v1743_v40 }
 0x453   : > { %v1817_v13 = vmax.f32 %v1744_v8, 0.0  ;;  %v4176_v52 = vpop.f32.mrf.mxu3 }
 0x454   : > { %v1791_v10 = vadd.f32 %v4142_v46, %v4176_v52 }
 0x458   : > { %v1574_v55 = vpop.permute.xlu0 %1573  ;;  %v1745_v62 = vpop.f32.mrf.mxu2 }
 0x459   : > { %v1638_v61 = vadd.f32 %v1574_v55, %v3991_v1  ;;  %v1734_v1 = vadd.f32 %v4142_v46, %v1733_v28  ;;  %v1746_v0 = vadd.f32 %v4142_v46, %v1745_v62 }
 0x45b   : > { %v1654_v27 = vpack.c.bf16 %v1638_v61, %v1637_v47  ;;  %v1813_v24 = vmax.f32 %v1734_v1, 0.0  ;;  %v1818_v31 = vmax.f32 %v1746_v0, 0.0  ;;  %v2868_v1 = vld [vmem:[%s4414_s11] sm:$0xff] }
 0x45c   : > { %2141 = vmatpush.bf16.msrb.mxu0 %v2868_v1 }
 0x45d   : > { %2751 = vmatmul.msk.bf16.gmra.mxu3 %vm1675_vm1, %v1654_v27  ;;  %v1845_v38 = vpack.c.bf16 %v1814_v42, %v1813_v24  ;;  %v1847_v15 = vpack.c.bf16 %v1818_v31, %v1817_v13  ;;  %v1771_v24 = vadd.f32 %v4142_v46, %v4132_v6 }
 0x45f   : > { %v1828_v40 = vmax.f32 %v1771_v24, 0.0 }
 0x460   : > { %v1748_v59 = vpop.f32.mrf.mxu2 }
 0x461   : > { %v1749_v60 = vadd.f32 %v4142_v46, %v1748_v59  ;;  %v1829_v59 = vmax.f32 %v1774_v3, 0.0 }
 0x463   : > { %v1819_v11 = vmax.f32 %v1749_v60, 0.0  ;;  %v4183_v5 = vpop.f32.mrf.mxu3 }
 0x468   : > { %v1750_v4 = vpop.f32.mrf.mxu2 }
 0x469   : > { %v1751_v9 = vadd.f32 %v4142_v46, %v1750_v4 }
 0x46b   : > { %v1820_v54 = vmax.f32 %v1751_v9, 0.0  ;;  %v4189_v19 = vpop.f32.mrf.mxu3 }
 0x46c   : > { %v1796_v52 = vadd.f32 %v4142_v46, %v4189_v19 }
 0x46d   : > { %1937 = vmatmul.bf16.vlgmr.msrb.gmra.mxu3 %v1845_v38  ;;  %v1848_v2 = vpack.c.bf16 %v1820_v54, %v1819_v11  ;;  %v1769_v38 = vadd.f32 %v4142_v46, %v4127_v20 }
 0x46e   : > { %v1838_v24 = vmax.f32 %v1796_v52, 0.0 }
 0x46f   : > { %v1827_v45 = vmax.f32 %v1769_v38, 0.0 }
 0x470   : > { %v1753_v17 = vpop.f32.mrf.mxu2 }
 0x471   : > { %v1754_v51 = vadd.f32 %v4142_v46, %v1753_v17  ;;  %v1852_v63 = vpack.c.bf16 %v1828_v40, %v1827_v45 }
 0x473   : > { %v1821_v58 = vmax.f32 %v1754_v51, 0.0 }
 0x478   : > { %v1755_v12 = vpop.f32.mrf.mxu2 }
 0x479   : > { %v1756_v30 = vadd.f32 %v4142_v46, %v1755_v12 }
 0x47b   : > { %v1822_v21 = vmax.f32 %v1756_v30, 0.0  ;;  %v1834_v30 = vmax.f32 %v1786_v33, 0.0 }
 0x47d   : > { %1942 = vmatmul.bf16.gmra.mxu3 %v1846_v44  ;;  %v1849_v36 = vpack.c.bf16 %v1822_v21, %v1821_v58  ;;  %v1830_v44 = vmax.f32 %v1776_v49, 0.0 }
 0x47f   : > { %v1853_v31 = vpack.c.bf16 %v1830_v44, %v1829_v59 }
 0x480   : > { %v1758_v18 = vpop.f32.mrf.mxu2 }
 0x481   : > { %v1759_v39 = vadd.f32 %v4142_v46, %v1758_v18 }
 0x483   : > { %v1823_v23 = vmax.f32 %v1759_v39, 0.0 }
 0x488   : > { %v1760_v25 = vpop.f32.mrf.mxu2 }
 0x489   : > { %v1761_v53 = vadd.f32 %v4142_v46, %v1760_v25 }
 0x48a   : > { %v4192_v55 = vpop.f32.mrf.mxu3 }
 0x48b   : > { %v1824_v50 = vmax.f32 %v1761_v53, 0.0 }
 0x48d   : > { %1947 = vmatmul.bf16.gmra.mxu3 %v1847_v15  ;;  %v1850_v22 = vpack.c.bf16 %v1824_v50, %v1823_v23  ;;  %v1779_v15 = vadd.f32 %v4142_v46, %v4151_v43  ;;  %v1784_v43 = vadd.f32 %v4142_v46, %v4165_v41  ;;  %v1789_v41 = vadd.f32 %v4142_v46, %v4174_v16 }
 0x48e   : > { %v1836_v50 = vmax.f32 %v1791_v10, 0.0  ;;  %v1794_v16 = vadd.f32 %v4142_v46, %v4183_v5  ;;  %v1799_v5 = vadd.f32 %v4142_v46, %v4192_v55 }
 0x48f   : > { %v1831_v60 = vmax.f32 %v1779_v15, 0.0  ;;  %v1833_v58 = vmax.f32 %v1784_v43, 0.0 }
 0x490   : > { %v1763_v28 = vpop.f32.mrf.mxu2  ;;  %v1837_v45 = vmax.f32 %v1794_v16, 0.0 }
 0x491   : > { %v1764_v48 = vadd.f32 %v4142_v46, %v1763_v28  ;;  %v1855_v53 = vpack.c.bf16 %v1834_v30, %v1833_v58 }
 0x492   : > { %v4196_v27 = vpop.f32.mrf.mxu3  ;;  %v1857_v3 = vpack.c.bf16 %v1838_v24, %v1837_v45 }
 0x493   : > { %v1825_v35 = vmax.f32 %v1764_v48, 0.0  ;;  %v1801_v19 = vadd.f32 %v4142_v46, %v4196_v27 }
 0x498   : > { %v1765_v47 = vpop.f32.mrf.mxu2 }
 0x499   : > { %v1766_v61 = vadd.f32 %v4142_v46, %v1765_v47  ;;  %v1835_v47 = vmax.f32 %v1789_v41, 0.0 }
 0x49b   : > { %v1826_v32 = vmax.f32 %v1766_v61, 0.0 }
 0x49d   : > { %1952 = vmatmul.bf16.gmra.mxu3 %v1848_v2  ;;  %v1851_v14 = vpack.c.bf16 %v1826_v32, %v1825_v35  ;;  %v1854_v2 = vpack.c.bf16 %v1832_v7, %v1831_v60  ;;  %v1856_v35 = vpack.c.bf16 %v1836_v50, %v1835_v47 }
 0x4ad   : > { %1957 = vmatmul.bf16.gmra.mxu3 %v1849_v36 }
 0x4b7   : > { %v4201_v42 = vpop.f32.mrf.mxu3 }
 0x4b8   : > { %v1804_v55 = vadd.f32 %v4142_v46, %v4201_v42 }
 0x4bd   : > { %1962 = vmatmul.bf16.gmra.mxu3 %v1850_v22 }
 0x4bf   : > { %v4207_v29 = vpop.f32.mrf.mxu3 }
 0x4c0   : > { %v1806_v27 = vadd.f32 %v4142_v46, %v4207_v29 }
 0x4cd   : > { %1967 = vmatmul.bf16.gmra.mxu3 %v1851_v14 }
 0x4dd   : > { %1972 = vmatmul.bf16.gmra.mxu3 %v1852_v63 }
 0x4e0   : > { %v1808_v62 = vpop.f32.mrf.mxu3 }
 0x4e1   : > { %v1809_v26 = vadd.f32 %v4142_v46, %v1808_v62 }
 0x4e3   : > { %v1843_v0 = vmax.f32 %v1809_v26, 0.0 }
 0x4e8   : > { %v1810_v6 = vpop.f32.mrf.mxu3 }
 0x4e9   : > { %v1811_v20 = vadd.f32 %v4142_v46, %v1810_v6  ;;  %v1840_v6 = vmax.f32 %v1801_v19, 0.0 }
 0x4eb   : > { %v1844_v8 = vmax.f32 %v1811_v20, 0.0 }
 0x4ed   : > { %1977 = vmatmul.bf16.gmra.mxu3 %v1853_v31  ;;  %v4215_v4 = vpack.c.bf16 %v1844_v8, %v1843_v0  ;;  %v1839_v0 = vmax.f32 %v1799_v5, 0.0  ;;  %v3057_v5 = vpop.permute.xlu2 %3056 }
 0x4ef   : > { %v1858_v34 = vpack.c.bf16 %v1840_v6, %v1839_v0  ;;  %v3058_v0 = vunpack.i.l.bf16 %v3057_v5 }
 0x4f0   : > { %v1938_v13 = vpop.f32.mrf.mxu3 }
 0x4f1   : > { %v1939_v17 = vadd.f32 %v4222_v37, %v1938_v13 }
 0x4f3   : > { %v2018_v11 = vmax.f32 %v1939_v17, 0.0  ;;  %v1842_v17 = vmax.f32 %v1806_v27, 0.0 }
 0x4f8   : > { %v1940_v9 = vpop.f32.mrf.mxu3 }
 0x4f9   : > { %v1941_v54 = vadd.f32 %v4222_v37, %v1940_v9 }
 0x4fb   : > { %v2019_v12 = vmax.f32 %v1941_v54, 0.0  ;;  %v1841_v54 = vmax.f32 %v1804_v55, 0.0 }
 0x4fd   : > { %1982 = vmatmul.bf16.gmra.mxu3 %v1854_v2  ;;  %v2050_v57 = vpack.c.bf16 %v2019_v12, %v2018_v11 }
 0x4ff   : > { %2142 = vmatmul.bf16.vlgmr.msrb.gmra.mxu0 %v2050_v57  ;;  %v1859_v57 = vpack.c.bf16 %v1842_v17, %v1841_v54 }
 0x500   : > { %v1943_v18 = vpop.f32.mrf.mxu3 }
 0x501   : > { %v1944_v51 = vadd.f32 %v4222_v37, %v1943_v18 }
 0x503   : > { %v2020_v25 = vmax.f32 %v1944_v51, 0.0 }
 0x508   : > { %v1945_v21 = vpop.f32.mrf.mxu3 }
 0x509   : > { %v1946_v36 = vadd.f32 %v4222_v37, %v1945_v21 }
 0x50b   : > { %v2021_v56 = vmax.f32 %v1946_v36, 0.0 }
 0x50d   : > { %1987 = vmatmul.bf16.gmra.mxu3 %v1855_v53  ;;  %v2051_v39 = vpack.c.bf16 %v2021_v56, %v2020_v25 }
 0x50f   : > { %2147 = vmatmul.bf16.gmra.mxu0 %v2051_v39 }
 0x510   : > { %v1948_v28 = vpop.f32.mrf.mxu3 }
 0x511   : > { %v1949_v23 = vadd.f32 %v4222_v37, %v1948_v28 }
 0x513   : > { %v2022_v48 = vmax.f32 %v1949_v23, 0.0 }
 0x518   : > { %v1950_v22 = vpop.f32.mrf.mxu3 }
 0x519   : > { %v1951_v61 = vadd.f32 %v4222_v37, %v1950_v22 }
 0x51b   : > { %v2023_v32 = vmax.f32 %v1951_v61, 0.0  ;;  %v4268_v61 = vld [vmem:[%s4447_s8] ss:$0 sm:$0xff] }
 0x51d   : > { %1992 = vmatmul.bf16.gmra.mxu3 %v1856_v35  ;;  %v2052_v14 = vpack.c.bf16 %v2023_v32, %v2022_v48  ;;  %v3052_v32 = vpop.permute.xlu1 %3051 }
 0x51e   : > { %v3053_v52 = vunpack.i.l.bf16 %v3052_v32 }
 0x51f   : > { %2152 = vmatmul.bf16.gmra.mxu0 %v2052_v14 }
 0x520   : > { %v1953_v1 = vpop.f32.mrf.mxu3 }
 0x521   : > { %v1954_v38 = vadd.f32 %v4222_v37, %v1953_v1  ;;  %v3054_v1 = vunpack.i.h.bf16 %v3052_v32 }
 0x523   : > { %v2024_v62 = vmax.f32 %v1954_v38, 0.0 }
 0x528   : > { %v1955_v40 = vpop.f32.mrf.mxu3 }
 0x529   : > { %v1956_v63 = vadd.f32 %v4222_v37, %v1955_v40 }
 0x52b   : > { %v2025_v49 = vmax.f32 %v1956_v63, 0.0 }
 0x52d   : > { %1997 = vmatmul.bf16.gmra.mxu3 %v1857_v3  ;;  %v2053_v44 = vpack.c.bf16 %v2025_v49, %v2024_v62 }
 0x52f   : > { %2157 = vmatmul.bf16.gmra.mxu0 %v2053_v44 }
 0x530   : > { %v1958_v26 = vpop.f32.mrf.mxu3 }
 0x531   : > { %v1959_v59 = vadd.f32 %v4222_v37, %v1958_v26 }
 0x533   : > { %v2026_v31 = vmax.f32 %v1959_v59, 0.0 }
 0x538   : > { %v1960_v20 = vpop.f32.mrf.mxu3 }
 0x539   : > { %v1961_v8 = vadd.f32 %v4222_v37, %v1960_v20  ;;  %v3059_v20 = vunpack.i.h.bf16 %v3057_v5 }
 0x53b   : > { %v2027_v13 = vmax.f32 %v1961_v8, 0.0 }
 0x53d   : > { %v2054_v15 = vpack.c.bf16 %v2027_v13, %v2026_v31  ;;  %2002 = vmatmul.bf16.gmra.mxu3 %v1858_v34 }
 0x53f   : > { %2162 = vmatmul.bf16.gmra.mxu0 %v2054_v15 }
 0x540   : > { %v1963_v7 = vpop.f32.mrf.mxu3 }
 0x541   : > { %v1964_v9 = vadd.f32 %v4222_v37, %v1963_v7 }
 0x543   : > { %v2028_v12 = vmax.f32 %v1964_v9, 0.0 }
 0x548   : > { %v1965_v60 = vpop.f32.mrf.mxu3 }
 0x549   : > { %v1966_v11 = vadd.f32 %v4222_v37, %v1965_v60 }
 0x54b   : > { %v2029_v2 = vmax.f32 %v1966_v11, 0.0  ;;  %v3062_v11 = vpop.permute.xlu0 %3061 }
 0x54d   : > { %v2055_v18 = vpack.c.bf16 %v2029_v2, %v2028_v12  ;;  %2007 = vmatmul.bf16.gmra.mxu3 %v1859_v57  ;;  %v3064_v57 = vunpack.i.h.bf16 %v3062_v11 }
 0x54f   : > { %2167 = vmatmul.bf16.gmra.mxu0 %v2055_v18  ;;  %v3063_v18 = vunpack.i.l.bf16 %v3062_v11 }
 0x550   : > { %v1968_v33 = vpop.f32.mrf.mxu3 }
 0x551   : > { %v1969_v43 = vadd.f32 %v4222_v37, %v1968_v33 }
 0x553   : > { %v2030_v46 = vmax.f32 %v1969_v43, 0.0 }
 0x558   : > { %v1970_v29 = vpop.f32.mrf.mxu3 }
 0x559   : > { %v1971_v30 = vadd.f32 %v4222_v37, %v1970_v29 }
 0x55b   : > { %v2031_v42 = vmax.f32 %v1971_v30, 0.0 }
 0x55d   : > { %v2056_v51 = vpack.c.bf16 %v2031_v42, %v2030_v46  ;;  %2012 = vmatmul.bf16.gmra.mxu3 %v4215_v4 }
 0x55f   : > { %2172 = vmatmul.bf16.gmra.mxu0 %v2056_v51 }
 0x560   : > { %v1973_v21 = vpop.f32.mrf.mxu3 }
 0x561   : > { %v1974_v58 = vadd.f32 %v4222_v37, %v1973_v21 }
 0x563   : > { %v2032_v56 = vmax.f32 %v1974_v58, 0.0 }
 0x568   : > { %v1975_v36 = vpop.f32.mrf.mxu3 }
 0x569   : > { %v1976_v25 = vadd.f32 %v4222_v37, %v1975_v36 }
 0x56b   : > { %v2033_v53 = vmax.f32 %v1976_v25, 0.0 }
 0x56d   : > { %v2057_v39 = vpack.c.bf16 %v2033_v53, %v2032_v56  ;;  %v3067_v53 = vpop.permute.xlu1 %3066 }
 0x56f   : > { %2177 = vmatmul.bf16.gmra.mxu0 %v2057_v39 }
 0x570   : > { %v1978_v28 = vpop.f32.mrf.mxu3 }
 0x571   : > { %v1979_v10 = vadd.f32 %v4222_v37, %v1978_v28 }
 0x573   : > { %v2034_v23 = vmax.f32 %v1979_v10, 0.0  ;;  %v3069_v10 = vunpack.i.h.bf16 %v3067_v53 }
 0x578   : > { %v1980_v41 = vpop.f32.mrf.mxu3 }
 0x579   : > { %v1981_v50 = vadd.f32 %v4222_v37, %v1980_v41  ;;  %v3068_v41 = vunpack.i.l.bf16 %v3067_v53 }
 0x57b   : > { %v2035_v22 = vmax.f32 %v1981_v50, 0.0 }
 0x57c   : > { %v2143_v4 = vpop.f32.mrf.mxu0 }
 0x57d   : > { %v2058_v47 = vpack.c.bf16 %v2035_v22, %v2034_v23  ;;  %v2144_v35 = vadd.f32 %v4268_v61, %v2143_v4 }
 0x57f   : > { %2182 = vmatmul.bf16.gmra.mxu0 %v2058_v47  ;;  %v2351_v24 = vsel %vm675_vm0, %v2144_v35, %v3053_v52 }
 0x580   : > { %v1983_v48 = vpop.f32.mrf.mxu3 }
 0x581   : > { %v1984_v38 = vadd.f32 %v4222_v37, %v1983_v48 }
 0x583   : > { %v2036_v49 = vmax.f32 %v1984_v38, 0.0 }
 0x584   : > { %v2145_v14 = vpop.f32.mrf.mxu0 }
 0x585   : > { %v2146_v16 = vadd.f32 %v4268_v61, %v2145_v14 }
 0x587   : > { %v2352_v40 = vsel %vm675_vm0, %v2146_v16, %v3054_v1 }
 0x588   : > { %v2880_v45 = vpack.c.bf16 %v2352_v40, %v2351_v24  ;;  %v1985_v63 = vpop.f32.mrf.mxu3  ;;  %v3072_v24 = vpop.permute.xlu2 %3071 }
 0x589   : > { %v1986_v62 = vadd.f32 %v4222_v37, %v1985_v63  ;;  %v3073_v63 = vunpack.i.l.bf16 %v3072_v24 }
 0x58a   : > { %2881 = vst [vmem:[%s4278_s25] sm:$0xff] %v2880_v45   ;;  %v3074_v45 = vunpack.i.h.bf16 %v3072_v24 }
 0x58b   : > { %v2037_v3 = vmax.f32 %v1986_v62, 0.0 }
 0x58c   : > { %v2148_v44 = vpop.f32.mrf.mxu0 }
 0x58d   : > { %v2059_v26 = vpack.c.bf16 %v2037_v3, %v2036_v49  ;;  %v2149_v6 = vadd.f32 %v4268_v61, %v2148_v44 }
 0x58f   : > { %2187 = vmatmul.bf16.gmra.mxu0 %v2059_v26  ;;  %v2353_v31 = vsel %vm675_vm0, %v2149_v6, %v3058_v0 }
 0x590   : > { %v1988_v19 = vpop.f32.mrf.mxu3 }
 0x591   : > { %v1989_v13 = vadd.f32 %v4222_v37, %v1988_v19 }
 0x593   : > { %v2038_v55 = vmax.f32 %v1989_v13, 0.0 }
 0x594   : > { %v2150_v59 = vpop.f32.mrf.mxu0 }
 0x595   : > { %v2151_v8 = vadd.f32 %v4268_v61, %v2150_v59 }
 0x597   : > { %v2354_v34 = vsel %vm675_vm0, %v2151_v8, %v3059_v20 }
 0x598   : > { %v2885_v15 = vpack.c.bf16 %v2354_v34, %v2353_v31  ;;  %v1990_v7 = vpop.f32.mrf.mxu3  ;;  %v3077_v31 = vpop.permute.xlu0 %3076 }
 0x599   : > { %v1991_v27 = vadd.f32 %v4222_v37, %v1990_v7  ;;  %v3078_v7 = vunpack.i.l.bf16 %v3077_v31 }
 0x59a   : > { %2957 = vst [vmem:[%s4278_s25 + $0x8] sm:$0xff] %v2885_v15   ;;  %v3079_v15 = vunpack.i.h.bf16 %v3077_v31 }
 0x59b   : > { %v2039_v17 = vmax.f32 %v1991_v27, 0.0 }
 0x59c   : > { %v2153_v9 = vpop.f32.mrf.mxu0 }
 0x59d   : > { %v2060_v60 = vpack.c.bf16 %v2039_v17, %v2038_v55  ;;  %v2154_v12 = vadd.f32 %v4268_v61, %v2153_v9 }
 0x59f   : > { %2192 = vmatmul.bf16.gmra.mxu0 %v2060_v60  ;;  %v2355_v43 = vsel %vm675_vm0, %v2154_v12, %v3063_v18 }
 0x5a0   : > { %v1993_v54 = vpop.f32.mrf.mxu3 }
 0x5a1   : > { %v1994_v29 = vadd.f32 %v4222_v37, %v1993_v54 }
 0x5a3   : > { %v2040_v21 = vmax.f32 %v1994_v29, 0.0 }
 0x5a4   : > { %v2155_v2 = vpop.f32.mrf.mxu0 }
 0x5a5   : > { %v2156_v33 = vadd.f32 %v4268_v61, %v2155_v2 }
 0x5a7   : > { %v2356_v30 = vsel %vm675_vm0, %v2156_v33, %v3064_v57 }
 0x5a8   : > { %v2890_v46 = vpack.c.bf16 %v2356_v30, %v2355_v43  ;;  %v1995_v42 = vpop.f32.mrf.mxu3  ;;  %v3082_v43 = vpop.permute.xlu1 %3081 }
 0x5a9   : > { %v1996_v51 = vadd.f32 %v4222_v37, %v1995_v42  ;;  %v3083_v42 = vunpack.i.l.bf16 %v3082_v43 }
 0x5aa   : > { %2958 = vst [vmem:[%s4278_s25 + $0x10] sm:$0xff] %v2890_v46   ;;  %v3084_v46 = vunpack.i.h.bf16 %v3082_v43 }
 0x5ab   : > { %v2041_v58 = vmax.f32 %v1996_v51, 0.0 }
 0x5ac   : > { %v2158_v36 = vpop.f32.mrf.mxu0 }
 0x5ad   : > { %v2061_v25 = vpack.c.bf16 %v2041_v58, %v2040_v21  ;;  %v2159_v39 = vadd.f32 %v4268_v61, %v2158_v36 }
 0x5af   : > { %2197 = vmatmul.bf16.gmra.mxu0 %v2061_v25  ;;  %v2357_v23 = vsel %vm675_vm0, %v2159_v39, %v3068_v41 }
 0x5b0   : > { %v1998_v56 = vpop.f32.mrf.mxu3 }
 0x5b1   : > { %v1999_v22 = vadd.f32 %v4222_v37, %v1998_v56 }
 0x5b3   : > { %v2042_v35 = vmax.f32 %v1999_v22, 0.0 }
 0x5b4   : > { %v2160_v28 = vpop.f32.mrf.mxu0 }
 0x5b5   : > { %v2161_v50 = vadd.f32 %v4268_v61, %v2160_v28 }
 0x5b7   : > { %v2358_v4 = vsel %vm675_vm0, %v2161_v50, %v3069_v10  ;;  %v3087_v50 = vpop.permute.xlu2 %3086 }
 0x5b8   : > { %v2895_v47 = vpack.c.bf16 %v2358_v4, %v2357_v23  ;;  %v2000_v48 = vpop.f32.mrf.mxu3  ;;  %v3089_v4 = vunpack.i.h.bf16 %v3087_v50 }
 0x5b9   : > { %v2001_v32 = vadd.f32 %v4222_v37, %v2000_v48 }
 0x5ba   : > { %2959 = vst [vmem:[%s4278_s25 + $0x18] sm:$0xff] %v2895_v47   ;;  %v3088_v47 = vunpack.i.l.bf16 %v3087_v50 }
 0x5bb   : > { %v2043_v14 = vmax.f32 %v2001_v32, 0.0 }
 0x5bc   : > { %v2163_v1 = vpop.f32.mrf.mxu0 }
 0x5bd   : > { %v2062_v52 = vpack.c.bf16 %v2043_v14, %v2042_v35  ;;  %v2164_v38 = vadd.f32 %v4268_v61, %v2163_v1  ;;  %v3092_v1 = vpop.permute.xlu0 %3091 }
 0x5be   : > { %v3094_v24 = vunpack.i.h.bf16 %v3092_v1 }
 0x5bf   : > { %2202 = vmatmul.bf16.gmra.mxu0 %v2062_v52  ;;  %v2359_v49 = vsel %vm675_vm0, %v2164_v38, %v3073_v63  ;;  %v3093_v38 = vunpack.i.l.bf16 %v3092_v1  ;;  %v3102_v31 = vpop.permute.xlu2 %3101 }
 0x5c0   : > { %v2003_v16 = vpop.f32.mrf.mxu3 }
 0x5c1   : > { %v2004_v3 = vadd.f32 %v4222_v37, %v2003_v16 }
 0x5c3   : > { %v2044_v6 = vmax.f32 %v2004_v3, 0.0  ;;  %v3097_v3 = vpop.permute.xlu1 %3096 }
 0x5c4   : > { %v2165_v40 = vpop.f32.mrf.mxu0 }
 0x5c5   : > { %v2166_v62 = vadd.f32 %v4268_v61, %v2165_v40 }
 0x5c7   : > { %v2360_v44 = vsel %vm675_vm0, %v2166_v62, %v3074_v45 }
 0x5c8   : > { %v2900_v26 = vpack.c.bf16 %v2360_v44, %v2359_v49  ;;  %v2005_v19 = vpop.f32.mrf.mxu3 }
 0x5c9   : > { %v2006_v5 = vadd.f32 %v4222_v37, %v2005_v19  ;;  %v3099_v19 = vunpack.i.h.bf16 %v3097_v3 }
 0x5ca   : > { %2960 = vst [vmem:[%s4278_s25 + $0x20] sm:$0xff] %v2900_v26  }
 0x5cb   : > { %v2045_v59 = vmax.f32 %v2006_v5, 0.0  ;;  %v3098_v5 = vunpack.i.l.bf16 %v3097_v3 }
 0x5cc   : > { %v2168_v20 = vpop.f32.mrf.mxu0 }
 0x5cd   : > { %v2063_v0 = vpack.c.bf16 %v2045_v59, %v2044_v6  ;;  %v2169_v13 = vadd.f32 %v4268_v61, %v2168_v20 }
 0x5cf   : > { %2207 = vmatmul.bf16.gmra.mxu0 %v2063_v0  ;;  %v2361_v55 = vsel %vm675_vm0, %v2169_v13, %v3078_v7  ;;  %v3103_v7 = vunpack.i.l.bf16 %v3102_v31 }
 0x5d0   : > { %v2008_v8 = vpop.f32.mrf.mxu3 }
 0x5d1   : > { %v2009_v17 = vadd.f32 %v4222_v37, %v2008_v8 }
 0x5d3   : > { %v2046_v12 = vmax.f32 %v2009_v17, 0.0 }
 0x5d4   : > { %v2170_v34 = vpop.f32.mrf.mxu0 }
 0x5d5   : > { %v2171_v27 = vadd.f32 %v4268_v61, %v2170_v34 }
 0x5d7   : > { %v2362_v9 = vsel %vm675_vm0, %v2171_v27, %v3079_v15  ;;  %v3104_v15 = vunpack.i.h.bf16 %v3102_v31 }
 0x5d8   : > { %v2905_v60 = vpack.c.bf16 %v2362_v9, %v2361_v55  ;;  %v2010_v54 = vpop.f32.mrf.mxu3 }
 0x5d9   : > { %v2011_v11 = vadd.f32 %v4222_v37, %v2010_v54  ;;  %v3107_v54 = vpop.permute.xlu0 %3106 }
 0x5da   : > { %2961 = vst [vmem:[%s4278_s25 + $0x28] sm:$0xff] %v2905_v60  }
 0x5db   : > { %v2047_v2 = vmax.f32 %v2011_v11, 0.0 }
 0x5dc   : > { %v2173_v57 = vpop.f32.mrf.mxu0 }
 0x5dd   : > { %v2064_v18 = vpack.c.bf16 %v2047_v2, %v2046_v12  ;;  %v2174_v29 = vadd.f32 %v4268_v61, %v2173_v57  ;;  %v3109_v2 = vunpack.i.h.bf16 %v3107_v54  ;;  %v3108_v57 = vunpack.i.l.bf16 %v3107_v54 }
 0x5df   : > { %2212 = vmatmul.bf16.gmra.mxu0 %v2064_v18  ;;  %v2363_v21 = vsel %vm675_vm0, %v2174_v29, %v3083_v42 }
 0x5e0   : > { %v2013_v33 = vpop.f32.mrf.mxu3 }
 0x5e1   : > { %v2014_v58 = vadd.f32 %v4222_v37, %v2013_v33 }
 0x5e3   : > { %v2048_v39 = vmax.f32 %v2014_v58, 0.0 }
 0x5e4   : > { %v2175_v30 = vpop.f32.mrf.mxu0 }
 0x5e5   : > { %v2176_v51 = vadd.f32 %v4268_v61, %v2175_v30 }
 0x5e7   : > { %v2364_v36 = vsel %vm675_vm0, %v2176_v51, %v3084_v46  ;;  %v3112_v46 = vpop.permute.xlu1 %3111 }
 0x5e8   : > { %v2910_v25 = vpack.c.bf16 %v2364_v36, %v2363_v21  ;;  %v2015_v56 = vpop.f32.mrf.mxu3  ;;  %v3114_v21 = vunpack.i.h.bf16 %v3112_v46  ;;  %v3113_v58 = vunpack.i.l.bf16 %v3112_v46 }
 0x5e9   : > { %v2016_v53 = vadd.f32 %v4222_v37, %v2015_v56 }
 0x5ea   : > { %2962 = vst [vmem:[%s4278_s25 + $0x30] sm:$0xff] %v2910_v25  }
 0x5eb   : > { %v2049_v28 = vmax.f32 %v2016_v53, 0.0 }
 0x5ec   : > { %v2178_v10 = vpop.f32.mrf.mxu0 }
 0x5ed   : > { %v2065_v41 = vpack.c.bf16 %v2049_v28, %v2048_v39  ;;  %v2179_v23 = vadd.f32 %v4268_v61, %v2178_v10  ;;  %v3117_v28 = vpop.permute.xlu2 %3116 }
 0x5ee   : > { %v3119_v50 = vunpack.i.h.bf16 %v3117_v28 }
 0x5ef   : > { %2217 = vmatmul.bf16.gmra.mxu0 %v2065_v41  ;;  %v2365_v32 = vsel %vm675_vm0, %v2179_v23, %v3088_v47  ;;  %v3118_v23 = vunpack.i.l.bf16 %v3117_v28 }
 0x5f4   : > { %v2180_v22 = vpop.f32.mrf.mxu0 }
 0x5f5   : > { %v2181_v48 = vadd.f32 %v4268_v61, %v2180_v22 }
 0x5f7   : > { %v2366_v37 = vsel %vm675_vm0, %v2181_v48, %v3089_v4 }
 0x5f8   : > { %v2915_v35 = vpack.c.bf16 %v2366_v37, %v2365_v32  ;;  %v3122_v37 = vpop.permute.xlu0 %3121 }
 0x5f9   : > { %v3124_v1 = vunpack.i.h.bf16 %v3122_v37 }
 0x5fa   : > { %2963 = vst [vmem:[%s4278_s25 + $0x38] sm:$0xff] %v2915_v35  }
 0x5fc   : > { %v2183_v14 = vpop.f32.mrf.mxu0 }
 0x5fd   : > { %v2184_v52 = vadd.f32 %v4268_v61, %v2183_v14 }
 0x5ff   : > { %v2367_v45 = vsel %vm675_vm0, %v2184_v52, %v3093_v38  ;;  %v3123_v52 = vunpack.i.l.bf16 %v3122_v37 }
 0x604   : > { %v2185_v16 = vpop.f32.mrf.mxu0 }
 0x605   : > { %v2186_v40 = vadd.f32 %v4268_v61, %v2185_v16 }
 0x607   : > { %v2368_v63 = vsel %vm675_vm0, %v2186_v40, %v3094_v24 }
 0x608   : > { %v2920_v62 = vpack.c.bf16 %v2368_v63, %v2367_v45  ;;  %v3127_v63 = vpop.permute.xlu1 %3126 }
 0x609   : > { %v3129_v3 = vunpack.i.h.bf16 %v3127_v63 }
 0x60a   : > { %2964 = vst [vmem:[%s4278_s25 + $0x40] sm:$0xff] %v2920_v62  }
 0x60c   : > { %v2188_v49 = vpop.f32.mrf.mxu0 }
 0x60d   : > { %v2189_v44 = vadd.f32 %v4268_v61, %v2188_v49 }
 0x60f   : > { %v2369_v59 = vsel %vm675_vm0, %v2189_v44, %v3098_v5  ;;  %v3128_v44 = vunpack.i.l.bf16 %v3127_v63 }
 0x614   : > { %v2190_v26 = vpop.f32.mrf.mxu0 }
 0x615   : > { %v2191_v6 = vadd.f32 %v4268_v61, %v2190_v26 }
 0x617   : > { %v2370_v20 = vsel %vm675_vm0, %v2191_v6, %v3099_v19 }
 0x618   : > { %v2925_v0 = vpack.c.bf16 %v2370_v20, %v2369_v59 }
 0x61a   : > { %2965 = vst [vmem:[%s4278_s25 + $0x48] sm:$0xff] %v2925_v0  }
 0x61c   : > { %v2193_v8 = vpop.f32.mrf.mxu0 }
 0x61d   : > { %v2194_v13 = vadd.f32 %v4268_v61, %v2193_v8 }
 0x61f   : > { %v2371_v55 = vsel %vm675_vm0, %v2194_v13, %v3103_v7 }
 0x624   : > { %v2195_v34 = vpop.f32.mrf.mxu0 }
 0x625   : > { %v2196_v27 = vadd.f32 %v4268_v61, %v2195_v34 }
 0x627   : > { %v2372_v17 = vsel %vm675_vm0, %v2196_v27, %v3104_v15 }
 0x628   : > { %v2930_v9 = vpack.c.bf16 %v2372_v17, %v2371_v55 }
 0x62a   : > { %2966 = vst [vmem:[%s4278_s25 + $0x50] sm:$0xff] %v2930_v9  }
 0x62c   : > { %v2198_v60 = vpop.f32.mrf.mxu0 }
 0x62d   : > { %v2199_v11 = vadd.f32 %v4268_v61, %v2198_v60 }
 0x62f   : > { %v2373_v33 = vsel %vm675_vm0, %v2199_v11, %v3108_v57 }
 0x634   : > { %v2200_v12 = vpop.f32.mrf.mxu0 }
 0x635   : > { %v2201_v18 = vadd.f32 %v4268_v61, %v2200_v12 }
 0x637   : > { %v2374_v43 = vsel %vm675_vm0, %v2201_v18, %v3109_v2 }
 0x638   : > { %v2935_v29 = vpack.c.bf16 %v2374_v43, %v2373_v33 }
 0x63a   : > { %2967 = vst [vmem:[%s4278_s25 + $0x58] sm:$0xff] %v2935_v29  }
 0x63c   : > { %v2203_v30 = vpop.f32.mrf.mxu0 }
 0x63d   : > { %v2204_v42 = vadd.f32 %v4268_v61, %v2203_v30 }
 0x63f   : > { %v2375_v25 = vsel %vm675_vm0, %v2204_v42, %v3113_v58 }
 0x644   : > { %v2205_v51 = vpop.f32.mrf.mxu0 }
 0x645   : > { %v2206_v36 = vadd.f32 %v4268_v61, %v2205_v51 }
 0x647   : > { %v2376_v56 = vsel %vm675_vm0, %v2206_v36, %v3114_v21 }
 0x648   : > { %v2940_v53 = vpack.c.bf16 %v2376_v56, %v2375_v25 }
 0x64a   : > { %2968 = vst [vmem:[%s4278_s25 + $0x60] sm:$0xff] %v2940_v53  }
 0x64c   : > { %v2208_v39 = vpop.f32.mrf.mxu0 }
 0x64d   : > { %v2209_v10 = vadd.f32 %v4268_v61, %v2208_v39 }
 0x64f   : > { %v2377_v4 = vsel %vm675_vm0, %v2209_v10, %v3118_v23 }
 0x654   : > { %v2210_v41 = vpop.f32.mrf.mxu0 }
 0x655   : > { %v2211_v22 = vadd.f32 %v4268_v61, %v2210_v41 }
 0x657   : > { %v2378_v47 = vsel %vm675_vm0, %v2211_v22, %v3119_v50 }
 0x658   : > { %v2945_v48 = vpack.c.bf16 %v2378_v47, %v2377_v4 }
 0x65a   : > { %2969 = vst [vmem:[%s4278_s25 + $0x68] sm:$0xff] %v2945_v48  }
 0x65c   : > { %v2213_v32 = vpop.f32.mrf.mxu0 }
 0x65d   : > { %v2214_v35 = vadd.f32 %v4268_v61, %v2213_v32 }
 0x65f   : > { %v2379_v24 = vsel %vm675_vm0, %v2214_v35, %v3123_v52 }
 0x664   : > { %v2215_v14 = vpop.f32.mrf.mxu0 }
 0x665   : > { %v2216_v16 = vadd.f32 %v4268_v61, %v2215_v14 }
 0x667   : > { %v2380_v38 = vsel %vm675_vm0, %v2216_v16, %v3124_v1 }
 0x668   : > { %v2950_v40 = vpack.c.bf16 %v2380_v38, %v2379_v24 }
 0x66a   : > { %2970 = vst [vmem:[%s4278_s25 + $0x70] sm:$0xff] %v2950_v40  }
 0x66c   : > { %v2218_v45 = vpop.f32.mrf.mxu0 }
 0x66d   : > { %v2219_v62 = vadd.f32 %v4268_v61, %v2218_v45 }
 0x66f   : > { %v2381_v19 = vsel %vm675_vm0, %v2219_v62, %v3128_v44 }
 0x674   : > { %v2220_v49 = vpop.f32.mrf.mxu0 }
 0x675   : > { %v2221_v26 = vadd.f32 %v4268_v61, %v2220_v49 }
 0x677   : > { %v2382_v5 = vsel %vm675_vm0, %v2221_v26, %v3129_v3 }
 0x678   : > { %v2955_v6 = vpack.c.bf16 %v2382_v5, %v2381_v19 }
 0x67a   : > { %2971 = vst [vmem:[%s4278_s25 + $0x78] sm:$0xff] %v2955_v6  }
 0x67b   : > { %3317 = shalt.err (!%p3314_p8)
}
 0x67c   : > { %s3368_s13 = smov 4  }
 0x67d   : > { %2988 = dma.vmem_to_hbm [thread:$0]  (%p3491_p11), %s2461_s23, 2048, %s2463_s30, %s2448_s29, %s3367_s24, %s3367_s24, %s3368_s13  }
 0x67e PF: > { %s4450_s7 = sld [smem:[#allocation12_spill]]  ;;  %p3010_p9 = scmp.ge.s32.totalorder %s3360_s28, 2 }
 0x680   : > { %p3002_p10 = pnand %p3010_p9, %p3495_p12 }
 0x682   : > { %p3003_p1 = pneg %p3002_p10 }
 0x684   : > { %s2477_s25 = sand.u32 1, %s4450_s7  }
 0x685   : > { %s2478_s15 = scalar_lea.sflag [#allocation4], %s2477_s25 }
 0x686   : > { %3343 = dma.done.wait (%p3003_p1), %s2478_s15, 2048  }
 0x687   : > { %3345 = vsyncadd (%p3003_p1), %s2478_s15, 4294965248  ;;  %s4452_s28 = sld [smem:[#allocation14_spill]]  ;;  %s4455_s25 = smov %s3352_s26 }
 0x688   : > { %s4453_s27 = sld [smem:[#allocation13_spill]] }
 0x689   : > { %s4454_s20 = sld [smem:[#allocation15_spill]] }
 0x68d   : > { %p27_p0 = scmp.ge.s32.totalorder %s4452_s28, 6  }
 0x68e   : > { %s4456_s26 = smov %s4453_s27 }
 0x68f   : > { %s4457_s27 = smov %s4454_s20  ;;  %29 = sbr.rel (!%p27_p0) target bundleno = 13 (0xd), region = 125 }
 0x694   :  { %2484 = vsyncpa [#allocation3], 1 }
 0x695   :  { %2486 = vsyncpa [#allocation3 + $0x1], 1 }
 0x696   :  { %2487 = vsyncpa [#allocation6], 1 }
 0x697   :  { %2488 = vsyncpa [#allocation4], 1 }
 0x698   :  { %2490 = vsyncpa [#allocation4 + $0x1], 1 }

</bundles_post_ra>
